<compile_context>
chip_gen: v6e
topology: v6e:2x2x1
jax: 0.10.0
libtpu: 0.0.40
codegen_flags: <defaults>
</compile_context>

<pallas_src>
import functools

import jax
import jax.numpy as jnp
from jax.experimental import pallas as pl
from jax.experimental.pallas import tpu as pltpu

F_IN = 429          # true input feature count
F_IN_PAD = 512      # padded to a multiple of 128 lanes
F_OUT = 39          # true output class count
F_OUT_PAD = 128     # padded to a full 128-lane store
H1, H2, H3 = 1024, 512, 128

# ---- one-time device detection (trace-time constants) ----------------------
try:
    _KIND = jax.devices()[0].device_kind.lower()
except Exception:
    _KIND = ""
_IS_V7X = ("v7" in _KIND) or ("7x" in _KIND)
# v6e/v7x have bf16 VPU + EUP -> bf16 epilogue; v5e and older keep f32 epilogue.
_OLD_GEN = any(tag in _KIND for tag in ("v2", "v3", "v4", "v5"))
EPILOGUE_DTYPE = jnp.float32 if _OLD_GEN else jnp.bfloat16


def mlp_kernel(x_ref,
               w1_ref, b1_ref,
               w2_ref, b2_ref,
               w3_ref, b3_ref,
               w4_ref, b4_ref,
               o_ref):
    def dense(h, w_ref, b_ref):
        # bf16 x bf16 on the MXU, f32 accumulation; epilogue dtype follows the
        # bias dtype (bf16 on v6e/v7x, f32 on older chips, f32 for the last
        # layer so the final store stays full precision).
        acc = jnp.dot(h.astype(jnp.bfloat16), w_ref[...],
                      preferred_element_type=jnp.float32)
        return acc.astype(b_ref.dtype) + b_ref[...]

    def sigmoid(v):
        # sigmoid(x) = 0.5 * (tanh(0.5 * x) + 1): one EUP push, no divide.
        return jnp.tanh(v * 0.5) * 0.5 + 0.5

    h = sigmoid(dense(x_ref[...], w1_ref, b1_ref))
    h = sigmoid(dense(h, w2_ref, b2_ref))
    h = sigmoid(dense(h, w3_ref, b3_ref))
    o_ref[...] = dense(h, w4_ref, b4_ref).astype(o_ref.dtype)


def _round_up(n, m):
    return ((n + m - 1) // m) * m


def prepare_params(params, epilogue_dtype=EPILOGUE_DTYPE):
    """One-time (outside the jitted forward) pad + cast of weights/biases."""
    return {
        "w1": jnp.pad(params["w1"], ((0, F_IN_PAD - F_IN), (0, 0))).astype(jnp.bfloat16),
        "w2": params["w2"].astype(jnp.bfloat16),
        "w3": params["w3"].astype(jnp.bfloat16),
        "w4": jnp.pad(params["w4"], ((0, 0), (0, F_OUT_PAD - F_OUT))).astype(jnp.bfloat16),
        "b1": params["b1"].astype(epilogue_dtype),
        "b2": params["b2"].astype(epilogue_dtype),
        "b3": params["b3"].astype(epilogue_dtype),
        # final bias stays f32: added to the f32 accumulator, stored as f32.
        "b4": jnp.pad(params["b4"], ((0, 0), (0, F_OUT_PAD - F_OUT))).astype(jnp.float32),
    }


@functools.partial(jax.jit, static_argnames=("max_tb",))
def classifier_forward(x, prepared, max_tb=512):
    """x: (B, 429) float32.  prepared: output of prepare_params()."""
    B = x.shape[0]

    # ---- host-side (XLA) padding / casting of the activations only --------
    # bf16 input halves the per-step x DMA; lane pad 429 -> 512 (zero columns
    # match the zero rows padded into w1).
    x_p = jnp.pad(x.astype(jnp.bfloat16), ((0, 0), (0, F_IN_PAD - F_IN)))

    # batch tile: >=8, at most max_tb; pad batch to a multiple of TB
    TB = min(max_tb, _round_up(B, 8))
    num_tiles = pl.cdiv(B, TB)
    Bp = num_tiles * TB
    if Bp != B:
        x_p = jnp.pad(x_p, ((0, Bp - B), (0, 0)))

    # ---- specs -------------------------------------------------------------
    x_spec = pl.BlockSpec((TB, F_IN_PAD), lambda i: (i, 0))
    out_spec = pl.BlockSpec((TB, F_OUT_PAD), lambda i: (i, 0))

    def resident(shape):
        # constant block index -> DMA'd once, stays VMEM-resident across steps
        return pl.BlockSpec(shape, lambda i: (0, 0))

    in_specs = [
        x_spec,
        resident((F_IN_PAD, H1)), resident((1, H1)),
        resident((H1, H2)),       resident((1, H2)),
        resident((H2, H3)),       resident((1, H3)),
        resident((H3, F_OUT_PAD)), resident((1, F_OUT_PAD)),
    ]

    # On v7x, CORE_PARALLEL shards the batch grid across the 2 TensorCores;
    # fall back to "parallel" on single-TC chips or odd/short grids.
    if _IS_V7X and num_tiles >= 2 and num_tiles % 2 == 0:
        dim_sem = (pltpu.CORE_PARALLEL,)
    else:
        dim_sem = ("parallel",)

    out = pl.pallas_call(
        mlp_kernel,
        out_shape=jax.ShapeDtypeStruct((Bp, F_OUT_PAD), jnp.float32),
        grid=(num_tiles,),
        in_specs=in_specs,
        out_specs=out_spec,
        compiler_params=pltpu.CompilerParams(
            dimension_semantics=dim_sem,
            vmem_limit_bytes=32 << 20,
        ),
    )(x_p,
      prepared["w1"], prepared["b1"],
      prepared["w2"], prepared["b2"],
      prepared["w3"], prepared["b3"],
      prepared["w4"], prepared["b4"])

    return out[:B, :F_OUT]


def init_params(key):
    """Deterministic init matching nn.Linear shapes; weights stored as (in, out)."""
    dims = [(F_IN, H1), (H1, H2), (H2, H3), (H3, F_OUT)]
    params = {}
    for idx, (fan_in, fan_out) in enumerate(dims, start=1):
        key, kw, kb = jax.random.split(key, 3)
        bound = 1.0 / jnp.sqrt(fan_in)
        # PyTorch Linear stores W as (out, in); we store W.T = (in, out).
        params[f"w{idx}"] = jax.random.uniform(
            kw, (fan_in, fan_out), jnp.float32, minval=-bound, maxval=bound)
        params[f"b{idx}"] = jax.random.uniform(
            kb, (1, fan_out), jnp.float32, minval=-bound, maxval=bound)
    return params


def reference_forward(x, params):
    """Pure f32 reference with the original PyTorch module semantics."""
    h = jax.nn.sigmoid(x @ params["w1"] + params["b1"])
    h = jax.nn.sigmoid(h @ params["w2"] + params["b2"])
    h = jax.nn.sigmoid(h @ params["w3"] + params["b3"])
    return h @ params["w4"] + params["b4"]


if __name__ == "__main__":
    key = jax.random.PRNGKey(0)
    key, kx1, kx2 = jax.random.split(key, 3)
    params = init_params(key)
    prepared = jax.block_until_ready(prepare_params(params))

    # Small single-tile case.
    B1 = 8
    x1 = jax.random.normal(kx1, (B1, F_IN), jnp.float32)
    out1 = jax.block_until_ready(classifier_forward(x1, prepared))
    ref1 = reference_forward(x1, params)
    assert out1.shape == (B1, F_OUT), out1.shape
    # bf16 MXU + bf16 epilogue vs pure-f32 reference -> loose tolerance.
    assert jnp.allclose(out1, ref1, atol=3e-2, rtol=3e-2), "mismatch vs reference (B=8)"

    # Multi-tile case exercising the batch grid + padding path.
    B2 = 1200
    x2 = jax.random.normal(kx2, (B2, F_IN), jnp.float32)
    out2 = jax.block_until_ready(classifier_forward(x2, prepared))
    ref2 = reference_forward(x2, params)
    assert out2.shape == (B2, F_OUT), out2.shape
    assert jnp.allclose(out2, ref2, atol=3e-2, rtol=3e-2), "mismatch vs reference (B=1200)"

    print("KERNEL_OK")
</pallas_src>

<mosaic_0001>
module attributes {stable_mosaic.version = 11 : i64} {
  func.func @mlp_kernel(%arg0: i32, %arg1: memref<8x512xbf16, #tpu.memory_space<vmem>>, %arg2: memref<512x1024xbf16, #tpu.memory_space<vmem>>, %arg3: memref<1x1024xbf16, #tpu.memory_space<vmem>>, %arg4: memref<1024x512xbf16, #tpu.memory_space<vmem>>, %arg5: memref<1x512xbf16, #tpu.memory_space<vmem>>, %arg6: memref<512x128xbf16, #tpu.memory_space<vmem>>, %arg7: memref<1x128xbf16, #tpu.memory_space<vmem>>, %arg8: memref<128x128xbf16, #tpu.memory_space<vmem>>, %arg9: memref<1x128xf32, #tpu.memory_space<vmem>>, %arg10: memref<8x128xf32, #tpu.memory_space<vmem>>) attributes {dimension_semantics = [#tpu.dimension_semantics<parallel>], iteration_bounds = array<i64: 1>, scalar_prefetch = 0 : i64, scratch_operands = 0 : i64, tpu.core_type = #tpu.core_type<tc>, window_params = [{transform_indices = @transform_0, window_bounds = array<i64: 8, 512>}, {pipeline_mode = #tpu.pipeline_mode<synchronous>, transform_indices = @transform_1, window_bounds = array<i64: 512, 1024>}, {pipeline_mode = #tpu.pipeline_mode<synchronous>, transform_indices = @transform_2, window_bounds = array<i64: 1, 1024>}, {pipeline_mode = #tpu.pipeline_mode<synchronous>, transform_indices = @transform_3, window_bounds = array<i64: 1024, 512>}, {pipeline_mode = #tpu.pipeline_mode<synchronous>, transform_indices = @transform_4, window_bounds = array<i64: 1, 512>}, {pipeline_mode = #tpu.pipeline_mode<synchronous>, transform_indices = @transform_5, window_bounds = array<i64: 512, 128>}, {pipeline_mode = #tpu.pipeline_mode<synchronous>, transform_indices = @transform_6, window_bounds = array<i64: 1, 128>}, {pipeline_mode = #tpu.pipeline_mode<synchronous>, transform_indices = @transform_7, window_bounds = array<i64: 128, 128>}, {pipeline_mode = #tpu.pipeline_mode<synchronous>, transform_indices = @transform_8, window_bounds = array<i64: 1, 128>}, {transform_indices = @transform_9, window_bounds = array<i64: 8, 128>}]} {
    %c0 = arith.constant 0 : index
    %c0_0 = arith.constant 0 : index
    %0 = vector.load %arg1[%c0, %c0_0] : memref<8x512xbf16, #tpu.memory_space<vmem>>, vector<8x512xbf16>
    %c0_1 = arith.constant 0 : index
    %c0_2 = arith.constant 0 : index
    %1 = vector.load %arg2[%c0_1, %c0_2] : memref<512x1024xbf16, #tpu.memory_space<vmem>>, vector<512x1024xbf16>
    %cst = arith.constant dense<0.000000e+00> : vector<8x1024xf32>
    %2 = tpu.matmul %0, %1, %cst {dimension_numbers = #tpu.dot_dimension_numbers<[1], [0], [0], [1], [0, 0, 1, 1], [], []>} : vector<8x512xbf16>, vector<512x1024xbf16>, vector<8x1024xf32> -> vector<8x1024xf32>
    %3 = arith.truncf %2 : vector<8x1024xf32> to vector<8x1024xbf16>
    %c0_3 = arith.constant 0 : index
    %c0_4 = arith.constant 0 : index
    %4 = vector.load %arg3[%c0_3, %c0_4] : memref<1x1024xbf16, #tpu.memory_space<vmem>>, vector<1x1024xbf16>
    %5 = vector.broadcast %4 : vector<1x1024xbf16> to vector<8x1024xbf16>
    %6 = arith.addf %3, %5 : vector<8x1024xbf16>
    %cst_5 = arith.constant 5.000000e-01 : bf16
    %7 = vector.broadcast %cst_5 : bf16 to vector<8x1024xbf16>
    %8 = arith.mulf %6, %7 : vector<8x1024xbf16>
    %9 = math.tanh %8 : vector<8x1024xbf16>
    %cst_6 = arith.constant 5.000000e-01 : bf16
    %10 = vector.broadcast %cst_6 : bf16 to vector<8x1024xbf16>
    %11 = arith.mulf %9, %10 : vector<8x1024xbf16>
    %cst_7 = arith.constant 5.000000e-01 : bf16
    %12 = vector.broadcast %cst_7 : bf16 to vector<8x1024xbf16>
    %13 = arith.addf %11, %12 : vector<8x1024xbf16>
    %c0_8 = arith.constant 0 : index
    %c0_9 = arith.constant 0 : index
    %14 = vector.load %arg4[%c0_8, %c0_9] : memref<1024x512xbf16, #tpu.memory_space<vmem>>, vector<1024x512xbf16>
    %cst_10 = arith.constant dense<0.000000e+00> : vector<8x512xf32>
    %15 = tpu.matmul %13, %14, %cst_10 {dimension_numbers = #tpu.dot_dimension_numbers<[1], [0], [0], [1], [0, 0, 1, 1], [], []>} : vector<8x1024xbf16>, vector<1024x512xbf16>, vector<8x512xf32> -> vector<8x512xf32>
    %16 = arith.truncf %15 : vector<8x512xf32> to vector<8x512xbf16>
    %c0_11 = arith.constant 0 : index
    %c0_12 = arith.constant 0 : index
    %17 = vector.load %arg5[%c0_11, %c0_12] : memref<1x512xbf16, #tpu.memory_space<vmem>>, vector<1x512xbf16>
    %18 = vector.broadcast %17 : vector<1x512xbf16> to vector<8x512xbf16>
    %19 = arith.addf %16, %18 : vector<8x512xbf16>
    %cst_13 = arith.constant 5.000000e-01 : bf16
    %20 = vector.broadcast %cst_13 : bf16 to vector<8x512xbf16>
    %21 = arith.mulf %19, %20 : vector<8x512xbf16>
    %22 = math.tanh %21 : vector<8x512xbf16>
    %cst_14 = arith.constant 5.000000e-01 : bf16
    %23 = vector.broadcast %cst_14 : bf16 to vector<8x512xbf16>
    %24 = arith.mulf %22, %23 : vector<8x512xbf16>
    %cst_15 = arith.constant 5.000000e-01 : bf16
    %25 = vector.broadcast %cst_15 : bf16 to vector<8x512xbf16>
    %26 = arith.addf %24, %25 : vector<8x512xbf16>
    %c0_16 = arith.constant 0 : index
    %c0_17 = arith.constant 0 : index
    %27 = vector.load %arg6[%c0_16, %c0_17] : memref<512x128xbf16, #tpu.memory_space<vmem>>, vector<512x128xbf16>
    %cst_18 = arith.constant dense<0.000000e+00> : vector<8x128xf32>
    %28 = tpu.matmul %26, %27, %cst_18 {dimension_numbers = #tpu.dot_dimension_numbers<[1], [0], [0], [1], [0, 0, 1, 1], [], []>} : vector<8x512xbf16>, vector<512x128xbf16>, vector<8x128xf32> -> vector<8x128xf32>
    %29 = arith.truncf %28 : vector<8x128xf32> to vector<8x128xbf16>
    %c0_19 = arith.constant 0 : index
    %c0_20 = arith.constant 0 : index
    %30 = vector.load %arg7[%c0_19, %c0_20] : memref<1x128xbf16, #tpu.memory_space<vmem>>, vector<1x128xbf16>
    %31 = vector.broadcast %30 : vector<1x128xbf16> to vector<8x128xbf16>
    %32 = arith.addf %29, %31 : vector<8x128xbf16>
    %cst_21 = arith.constant 5.000000e-01 : bf16
    %33 = vector.broadcast %cst_21 : bf16 to vector<8x128xbf16>
    %34 = arith.mulf %32, %33 : vector<8x128xbf16>
    %35 = math.tanh %34 : vector<8x128xbf16>
    %cst_22 = arith.constant 5.000000e-01 : bf16
    %36 = vector.broadcast %cst_22 : bf16 to vector<8x128xbf16>
    %37 = arith.mulf %35, %36 : vector<8x128xbf16>
    %cst_23 = arith.constant 5.000000e-01 : bf16
    %38 = vector.broadcast %cst_23 : bf16 to vector<8x128xbf16>
    %39 = arith.addf %37, %38 : vector<8x128xbf16>
    %c0_24 = arith.constant 0 : index
    %c0_25 = arith.constant 0 : index
    %40 = vector.load %arg8[%c0_24, %c0_25] : memref<128x128xbf16, #tpu.memory_space<vmem>>, vector<128x128xbf16>
    %cst_26 = arith.constant dense<0.000000e+00> : vector<8x128xf32>
    %41 = tpu.matmul %39, %40, %cst_26 {dimension_numbers = #tpu.dot_dimension_numbers<[1], [0], [0], [1], [0, 0, 1, 1], [], []>} : vector<8x128xbf16>, vector<128x128xbf16>, vector<8x128xf32> -> vector<8x128xf32>
    %c0_27 = arith.constant 0 : index
    %c0_28 = arith.constant 0 : index
    %42 = vector.load %arg9[%c0_27, %c0_28] : memref<1x128xf32, #tpu.memory_space<vmem>>, vector<1x128xf32>
    %43 = vector.broadcast %42 : vector<1x128xf32> to vector<8x128xf32>
    %44 = arith.addf %41, %43 : vector<8x128xf32>
    %c0_29 = arith.constant 0 : index
    %c0_30 = arith.constant 0 : index
    %45 = vector.load %arg10[%c0_29, %c0_30] : memref<8x128xf32, #tpu.memory_space<vmem>>, vector<8x128xf32>
    tpu.vector_store %arg10[%c0_29, %c0_30], %44 {strides = array<i32>} : memref<8x128xf32, #tpu.memory_space<vmem>>, vector<8x128xf32>,
    return
  }
  func.func @transform_0(%arg0: i32) -> (i32, i32) {
    %c0_i32 = arith.constant 0 : i32
    %c0_i32_0 = arith.constant 0 : i32
    return %arg0, %c0_i32 : i32, i32
  }
  func.func @transform_1(%arg0: i32) -> (i32, i32) {
    %c0_i32 = arith.constant 0 : i32
    %c0_i32_0 = arith.constant 0 : i32
    %c0_i32_1 = arith.constant 0 : i32
    return %c0_i32, %c0_i32_0 : i32, i32
  }
  func.func @transform_2(%arg0: i32) -> (i32, i32) {
    %c0_i32 = arith.constant 0 : i32
    %c0_i32_0 = arith.constant 0 : i32
    %c0_i32_1 = arith.constant 0 : i32
    return %c0_i32, %c0_i32_0 : i32, i32
  }
  func.func @transform_3(%arg0: i32) -> (i32, i32) {
    %c0_i32 = arith.constant 0 : i32
    %c0_i32_0 = arith.constant 0 : i32
    %c0_i32_1 = arith.constant 0 : i32
    return %c0_i32, %c0_i32_0 : i32, i32
  }
  func.func @transform_4(%arg0: i32) -> (i32, i32) {
    %c0_i32 = arith.constant 0 : i32
    %c0_i32_0 = arith.constant 0 : i32
    %c0_i32_1 = arith.constant 0 : i32
    return %c0_i32, %c0_i32_0 : i32, i32
  }
  func.func @transform_5(%arg0: i32) -> (i32, i32) {
    %c0_i32 = arith.constant 0 : i32
    %c0_i32_0 = arith.constant 0 : i32
    %c0_i32_1 = arith.constant 0 : i32
    return %c0_i32, %c0_i32_0 : i32, i32
  }
  func.func @transform_6(%arg0: i32) -> (i32, i32) {
    %c0_i32 = arith.constant 0 : i32
    %c0_i32_0 = arith.constant 0 : i32
    %c0_i32_1 = arith.constant 0 : i32
    return %c0_i32, %c0_i32_0 : i32, i32
  }
  func.func @transform_7(%arg0: i32) -> (i32, i32) {
    %c0_i32 = arith.constant 0 : i32
    %c0_i32_0 = arith.constant 0 : i32
    %c0_i32_1 = arith.constant 0 : i32
    return %c0_i32, %c0_i32_0 : i32, i32
  }
  func.func @transform_8(%arg0: i32) -> (i32, i32) {
    %c0_i32 = arith.constant 0 : i32
    %c0_i32_0 = arith.constant 0 : i32
    %c0_i32_1 = arith.constant 0 : i32
    return %c0_i32, %c0_i32_0 : i32, i32
  }
  func.func @transform_9(%arg0: i32) -> (i32, i32) {
    %c0_i32 = arith.constant 0 : i32
    %c0_i32_0 = arith.constant 0 : i32
    return %arg0, %c0_i32 : i32, i32
  }
}

</mosaic_0001>

<bundles_post_ra>
// kernel: classifier_forward.1
= control target key start
LH: loop header
LB: loop body
LE: loop exit
PB: predicated region body
PF: predicated region fallthrough
CT: control target
= control target key end

     0   :  { %14 = vsyncpa [#allocation3], 0  ;;  %s5993_s0 = inlined_call_operand.vmem [shape: bf16[8,512], index: 0, kind: input, shape index: {}]   ;;  %s5994_s1 = inlined_call_operand.hbm [shape: bf16[512,1024], index: 1, kind: input, shape index: {}]   ;;  %s5995_s2 = inlined_call_operand.vmem [shape: bf16[1,1024], index: 2, kind: input, shape index: {}]   ;;  %s5996_s3 = inlined_call_operand.hbm [shape: bf16[1024,512], index: 3, kind: input, shape index: {}]   ;;  %s5997_s4 = inlined_call_operand.vmem [shape: bf16[1,512], index: 4, kind: input, shape index: {}]   ;;  %s5998_s5 = inlined_call_operand.hbm [shape: bf16[512,128], index: 5, kind: input, shape index: {}]   ;;  %s5999_s6 = inlined_call_operand.vmem [shape: bf16[1,128], index: 6, kind: input, shape index: {}]   ;;  %s6000_s7 = inlined_call_operand.vmem [shape: bf16[128,128], index: 7, kind: input, shape index: {}]   ;;  %s6001_s8 = inlined_call_operand.vmem [shape: f32[1,128], index: 8, kind: input, shape index: {}]   ;;  %s6002_s9 = inlined_call_operand.hbm [shape: f32[8,128], index: 9, kind: output, shape index: {}]  }
   0x1   :  { %15 = vsyncpa [#allocation6], 0 }
   0x2   :  { %16 = vsyncpa [#allocation4], 0  ;;  %s5716_s30 = smov [#allocation5]  }
   0x3   :  { %s38_s10 = sshll.u32 %s5716_s30, 4  ;;  %s39_s10 = int_to_ptr.vmem [resolvable:$true] %s38_s10 }
   0x4   :  { %s5638_s11 = scalar_lea.vmem %s39_s10, 32768  ;;  %p5643_p1 = scmp.lt.s32.totalorder %s39_s10, %s39_s10 }
   0x5   :  { %p5639_p0 = scmp.ne.s32.totalorder %s39_s10, %s5638_s11  ;;  %p5644_p2 = scmp.lt.s32.totalorder %s5638_s11, %s5638_s11 }
   0x7   :  { %p5645_p3 = por %p5644_p2, %p5643_p1 }
   0x9   :  { %p5646_p4 = pnand %p5645_p3, %p5639_p0 }
   0xb   :  { %5649 = shalt.err (!%p5646_p4)
}
   0xc   :  { %s5717_s12 = smov 256   ;;  %s5718_s13 = smov 16  }
   0xd   :  { %44 = dma.hbm_to_vmem [thread:$0]  %s5996_s3, 32768, %s39_s10, [#allocation6], %s5717_s12, %s5717_s12, %s5718_s13  }
   0xe   :  { %s5719_s16 = smov [#allocation2]  }
   0xf   :  { %s24_s17 = sshll.u32 %s5719_s16, 4  ;;  %s25_s17 = int_to_ptr.vmem [resolvable:$true] %s24_s17 }
  0x10   :  { %s5658_s18 = scalar_lea.vmem %s25_s17, 32768  ;;  %p5663_p6 = scmp.lt.s32.totalorder %s25_s17, %s25_s17 }
  0x11   :  { %p5659_p5 = scmp.ne.s32.totalorder %s25_s17, %s5658_s18  ;;  %p5664_p7 = scmp.lt.s32.totalorder %s5658_s18, %s5658_s18 }
  0x13   :  { %p5665_p8 = por %p5664_p7, %p5663_p6 }
  0x15   :  { %p5666_p9 = pnand %p5665_p8, %p5659_p5 }
  0x17   :  { %5669 = shalt.err (!%p5666_p9)
}
  0x18   :  { %s5720_s19 = smov 512   ;;  %s5721_s20 = smov 32  }
  0x19   :  { %30 = dma.hbm_to_vmem [thread:$0]  %s5994_s1, 32768, %s25_s17, [#allocation3], %s5720_s19, %s5720_s19, %s5721_s20  }
  0x1a   :  { %s5722_s23 = smov [#allocation7]  }
  0x1b   :  { %s52_s24 = sshll.u32 %s5722_s23, 4  ;;  %s53_s24 = int_to_ptr.vmem [resolvable:$true] %s52_s24 }
  0x1c   :  { %s5678_s3 = scalar_lea.vmem %s53_s24, 4096  ;;  %p5683_p11 = scmp.lt.s32.totalorder %s53_s24, %s53_s24 }
  0x1d   :  { %p5679_p10 = scmp.ne.s32.totalorder %s53_s24, %s5678_s3  ;;  %p5684_p12 = scmp.lt.s32.totalorder %s5678_s3, %s5678_s3 }
  0x1f   :  { %p5685_p13 = por %p5684_p12, %p5683_p11 }
  0x21   :  { %p5686_p0 = pnand %p5685_p13, %p5679_p10 }
  0x23   :  { %5689 = shalt.err (!%p5686_p0)
}
  0x24   :  { %s5723_s25 = smov 64   ;;  %s5724_s26 = smov 4  }
  0x25   :  { %58 = dma.hbm_to_vmem [thread:$0]  %s5998_s5, 4096, %s53_s24, [#allocation6], %s5723_s25, %s5723_s25, %s5724_s26  }
  0x26   :  { %5710 = dma.done.wait [#allocation3], 32768  }
  0x27   :  { %5711 = vsyncadd [#allocation3], 4294934528 }
  0x28   :  { %5712 = dma.done.wait [#allocation6], 36864  }
  0x29   :  { %5713 = vsyncadd [#allocation6], 4294930432  ;;  %v134_v0 = vld [vmem:[#allocation2 + $0x1c0] sm:$0xff]  ;;  %v5796_v54 = vld [vmem:[%s5993_s0 + $0x8] sm:$0xff]  ;;  %vm5727_vm0 = vmmov 0  }
  0x2a   :  { %v138_v1 = vld [vmem:[#allocation2 + $0x1e0] sm:$0xff]  ;;  %v5804_v59 = vcombine.high %v5796_v54, %v5796_v54 }
  0x2b   :  { %v262_v2 = vld [vmem:[#allocation2 + $0x5c0] sm:$0xff]  ;;  %v4592_v3 = vcombine.high %v134_v0, %v138_v1  ;;  %v4591_v5 = vcombine.low %v134_v0, %v138_v1 }
  0x2c   :  { %v266_v4 = vld [vmem:[#allocation2 + $0x5e0] sm:$0xff]  ;;  %1701 = vmatprep.mubr.bf16.mxu1 %v5804_v59 }
  0x2d   :  { %v126_v6 = vld [vmem:[#allocation2 + $0x180] sm:$0xff]  ;;  %v4720_v8 = vcombine.high %v262_v2, %v266_v4  ;;  %v4719_v9 = vcombine.low %v262_v2, %v266_v4  ;;  %1628 = vmatprep.subr.bf16.mxu0 %v4592_v3 }
  0x2e   :  { %v130_v7 = vld [vmem:[#allocation2 + $0x1a0] sm:$0xff]  ;;  %1629 = vmatpush1.bf16.msra.mxu0 %v4591_v5 }
  0x2f   :  { %v4584_v10 = vcombine.high %v126_v6, %v130_v7  ;;  %v254_v11 = vld [vmem:[#allocation2 + $0x580] sm:$0xff]  ;;  %1669 = vmatprep.subr.bf16.mxu1 %v4720_v8  ;;  %v4583_v18 = vcombine.low %v126_v6, %v130_v7 }
  0x30   :  { %v258_v12 = vld [vmem:[#allocation2 + $0x5a0] sm:$0xff]  ;;  %1670 = vmatpush1.bf16.msra.mxu1 %v4719_v9 }
  0x31   :  { %v118_v13 = vld [vmem:[#allocation2 + $0x140] sm:$0xff]  ;;  %v4712_v14 = vcombine.high %v254_v11, %v258_v12  ;;  %1630 = vmatprep.subr.bf16.mxu0 %v4584_v10  ;;  %v4711_v19 = vcombine.low %v254_v11, %v258_v12 }
  0x32   :  { %v122_v15 = vld [vmem:[#allocation2 + $0x160] sm:$0xff]  ;;  %1631 = vmatpush1.bf16.msra.mxu0 %v4583_v18 }
  0x33   :  { %v246_v16 = vld [vmem:[#allocation2 + $0x540] sm:$0xff]  ;;  %v4576_v20 = vcombine.high %v118_v13, %v122_v15  ;;  %1671 = vmatprep.subr.bf16.mxu1 %v4712_v14  ;;  %v4575_v26 = vcombine.low %v118_v13, %v122_v15 }
  0x34   :  { %v250_v17 = vld [vmem:[#allocation2 + $0x560] sm:$0xff]  ;;  %1672 = vmatpush1.bf16.msra.mxu1 %v4711_v19 }
  0x35   :  { %v4704_v21 = vcombine.high %v246_v16, %v250_v17  ;;  %v110_v22 = vld [vmem:[#allocation2 + $0x100] sm:$0xff]  ;;  %1632 = vmatprep.subr.bf16.mxu0 %v4576_v20  ;;  %v4703_v27 = vcombine.low %v246_v16, %v250_v17 }
  0x36   :  { %v114_v23 = vld [vmem:[#allocation2 + $0x120] sm:$0xff]  ;;  %1633 = vmatpush1.bf16.msra.mxu0 %v4575_v26 }
  0x37   :  { %v238_v24 = vld [vmem:[#allocation2 + $0x500] sm:$0xff]  ;;  %v4568_v28 = vcombine.high %v110_v22, %v114_v23  ;;  %1673 = vmatprep.subr.bf16.mxu1 %v4704_v21  ;;  %v4567_v34 = vcombine.low %v110_v22, %v114_v23 }
  0x38   :  { %v242_v25 = vld [vmem:[#allocation2 + $0x520] sm:$0xff]  ;;  %1674 = vmatpush1.bf16.msra.mxu1 %v4703_v27 }
  0x39   :  { %v4696_v29 = vcombine.high %v238_v24, %v242_v25  ;;  %v102_v30 = vld [vmem:[#allocation2 + $0xc0] sm:$0xff]  ;;  %1634 = vmatprep.subr.bf16.mxu0 %v4568_v28  ;;  %v4695_v35 = vcombine.low %v238_v24, %v242_v25 }
  0x3a   :  { %v106_v31 = vld [vmem:[#allocation2 + $0xe0] sm:$0xff]  ;;  %1635 = vmatpush1.bf16.msra.mxu0 %v4567_v34 }
  0x3b   :  { %v230_v32 = vld [vmem:[#allocation2 + $0x4c0] sm:$0xff]  ;;  %v4560_v36 = vcombine.high %v102_v30, %v106_v31  ;;  %1675 = vmatprep.subr.bf16.mxu1 %v4696_v29  ;;  %v4559_v42 = vcombine.low %v102_v30, %v106_v31 }
  0x3c   :  { %v234_v33 = vld [vmem:[#allocation2 + $0x4e0] sm:$0xff]  ;;  %1676 = vmatpush1.bf16.msra.mxu1 %v4695_v35 }
  0x3d   :  { %v4688_v37 = vcombine.high %v230_v32, %v234_v33  ;;  %v94_v38 = vld [vmem:[#allocation2 + $0x80] sm:$0xff]  ;;  %1636 = vmatprep.subr.bf16.mxu0 %v4560_v36  ;;  %v4687_v43 = vcombine.low %v230_v32, %v234_v33 }
  0x3e   :  { %v98_v39 = vld [vmem:[#allocation2 + $0xa0] sm:$0xff]  ;;  %1637 = vmatpush1.bf16.msra.mxu0 %v4559_v42 }
  0x3f   :  { %v222_v40 = vld [vmem:[#allocation2 + $0x480] sm:$0xff]  ;;  %v4552_v44 = vcombine.high %v94_v38, %v98_v39  ;;  %1677 = vmatprep.subr.bf16.mxu1 %v4688_v37  ;;  %v4551_v50 = vcombine.low %v94_v38, %v98_v39 }
  0x40   :  { %v226_v41 = vld [vmem:[#allocation2 + $0x4a0] sm:$0xff]  ;;  %1678 = vmatpush1.bf16.msra.mxu1 %v4687_v43 }
  0x41   :  { %v4680_v45 = vcombine.high %v222_v40, %v226_v41  ;;  %v86_v46 = vld [vmem:[#allocation2 + $0x40] sm:$0xff]  ;;  %1638 = vmatprep.subr.bf16.mxu0 %v4552_v44  ;;  %v4679_v51 = vcombine.low %v222_v40, %v226_v41 }
  0x42   :  { %v90_v47 = vld [vmem:[#allocation2 + $0x60] sm:$0xff]  ;;  %1639 = vmatpush1.bf16.msra.mxu0 %v4551_v50 }
  0x43   :  { %v214_v48 = vld [vmem:[#allocation2 + $0x440] sm:$0xff]  ;;  %v4544_v52 = vcombine.high %v86_v46, %v90_v47  ;;  %1679 = vmatprep.subr.bf16.mxu1 %v4680_v45  ;;  %v4543_v62 = vcombine.low %v86_v46, %v90_v47 }
  0x44   :  { %v218_v49 = vld [vmem:[#allocation2 + $0x460] sm:$0xff]  ;;  %1680 = vmatpush1.bf16.msra.mxu1 %v4679_v51 }
  0x45   :  { %v5791_v53 = vld [vmem:[%s5993_s0] sm:$0xff]  ;;  %v4672_v55 = vcombine.high %v214_v48, %v218_v49  ;;  %1640 = vmatprep.subr.bf16.mxu0 %v4544_v52  ;;  %v4671_v63 = vcombine.low %v214_v48, %v218_v49 }
  0x46   :  { %v78_v56 = vld [vmem:[#allocation2] sm:$0xff]  ;;  %v5800_v58 = vcombine.high %v5791_v53, %v5791_v53  ;;  %1641 = vmatpush1.bf16.msra.mxu0 %v4543_v62 }
  0x47   :  { %v82_v57 = vld [vmem:[#allocation2 + $0x20] sm:$0xff]  ;;  %1681 = vmatprep.subr.bf16.mxu1 %v4672_v55 }
  0x48   :  { %v206_v60 = vld [vmem:[#allocation2 + $0x400] sm:$0xff]  ;;  %1660 = vmatprep.mubr.bf16.mxu0 %v5800_v58  ;;  %v4536_v0 = vcombine.high %v78_v56, %v82_v57  ;;  %v4535_v6 = vcombine.low %v78_v56, %v82_v57  ;;  %1682 = vmatpush1.bf16.msra.mxu1 %v4671_v63 }
  0x49   :  { %v210_v61 = vld [vmem:[#allocation2 + $0x420] sm:$0xff] }
  0x4a   :  { %v4664_v1 = vcombine.high %v206_v60, %v210_v61  ;;  %v198_v2 = vld [vmem:[#allocation2 + $0x3c0] sm:$0xff]  ;;  %1642 = vmatprep.subr.bf16.mxu0 %v4536_v0  ;;  %v4663_v7 = vcombine.low %v206_v60, %v210_v61 }
  0x4b   :  { %v202_v3 = vld [vmem:[#allocation2 + $0x3e0] sm:$0xff]  ;;  %1643 = vmatpush1.bf16.msra.mxu0 %v4535_v6  ;;  %v135_v6 = vld [vmem:[#allocation2 + $0x1c8] sm:$0xff] }
  0x4c   :  { %v326_v4 = vld [vmem:[#allocation2 + $0x7c0] sm:$0xff]  ;;  %v4656_v8 = vcombine.high %v198_v2, %v202_v3  ;;  %1683 = vmatprep.subr.bf16.mxu1 %v4664_v1  ;;  %v4655_v14 = vcombine.low %v198_v2, %v202_v3 }
  0x4d   :  { %v330_v5 = vld [vmem:[#allocation2 + $0x7e0] sm:$0xff]  ;;  %1684 = vmatpush1.bf16.msra.mxu1 %v4663_v7  ;;  %v139_v7 = vld [vmem:[#allocation2 + $0x1e8] sm:$0xff] }
  0x4e   :  { %v4784_v9 = vcombine.high %v326_v4, %v330_v5  ;;  %v190_v10 = vld [vmem:[#allocation2 + $0x380] sm:$0xff]  ;;  %1644 = vmatprep.subr.bf16.mxu0 %v4656_v8  ;;  %v4783_v15 = vcombine.low %v326_v4, %v330_v5  ;;  %v263_v8 = vld [vmem:[#allocation2 + $0x5c8] sm:$0xff] }
  0x4f   :  { %v194_v11 = vld [vmem:[#allocation2 + $0x3a0] sm:$0xff]  ;;  %1645 = vmatpush2.bf16.msra.mxu0 %v4655_v14  ;;  %v127_v14 = vld [vmem:[#allocation2 + $0x188] sm:$0xff] }
  0x50   :  { %v318_v12 = vld [vmem:[#allocation2 + $0x780] sm:$0xff]  ;;  %v4648_v16 = vcombine.high %v190_v10, %v194_v11  ;;  %1685 = vmatprep.subr.bf16.mxu1 %v4784_v9  ;;  %v4647_v22 = vcombine.low %v190_v10, %v194_v11  ;;  %v267_v9 = vld [vmem:[#allocation2 + $0x5e8] sm:$0xff] }
  0x51   :  { %v322_v13 = vld [vmem:[#allocation2 + $0x7a0] sm:$0xff]  ;;  %1686 = vmatpush2.bf16.msra.mxu1 %v4783_v15  ;;  %v131_v15 = vld [vmem:[#allocation2 + $0x1a8] sm:$0xff] }
  0x52   :  { %v4776_v17 = vcombine.high %v318_v12, %v322_v13  ;;  %v182_v18 = vld [vmem:[#allocation2 + $0x340] sm:$0xff]  ;;  %1646 = vmatprep.subr.bf16.mxu0 %v4648_v16  ;;  %v4775_v23 = vcombine.low %v318_v12, %v322_v13  ;;  %v4594_v12 = vcombine.high %v135_v6, %v139_v7  ;;  %v4722_v13 = vcombine.high %v263_v8, %v267_v9 }
  0x53   :  { %v186_v19 = vld [vmem:[#allocation2 + $0x360] sm:$0xff]  ;;  %1647 = vmatpush2.bf16.msra.mxu0 %v4647_v22  ;;  %v5810_v16 = vcombine.low %v5791_v53, %v5791_v53  ;;  %v4586_v22 = vcombine.high %v127_v14, %v131_v15  ;;  %v4585_v53 = vcombine.low %v127_v14, %v131_v15 }
  0x54   :  { %v310_v20 = vld [vmem:[#allocation2 + $0x740] sm:$0xff]  ;;  %v4640_v24 = vcombine.high %v182_v18, %v186_v19  ;;  %1687 = vmatprep.subr.bf16.mxu1 %v4776_v17  ;;  %v4639_v30 = vcombine.low %v182_v18, %v186_v19  ;;  %v255_v17 = vld [vmem:[#allocation2 + $0x588] sm:$0xff]  ;;  %v5814_v19 = vcombine.low %v5796_v54, %v5796_v54 }
  0x55   :  { %v314_v21 = vld [vmem:[#allocation2 + $0x760] sm:$0xff]  ;;  %1688 = vmatpush2.bf16.msra.mxu1 %v4775_v23  ;;  %v259_v18 = vld [vmem:[#allocation2 + $0x5a8] sm:$0xff] }
  0x56   :  { %v4768_v25 = vcombine.high %v310_v20, %v314_v21  ;;  %v174_v26 = vld [vmem:[#allocation2 + $0x300] sm:$0xff]  ;;  %1648 = vmatprep.subr.bf16.mxu0 %v4640_v24  ;;  %v4767_v31 = vcombine.low %v310_v20, %v314_v21  ;;  %v4593_v20 = vcombine.low %v135_v6, %v139_v7  ;;  %v4721_v21 = vcombine.low %v263_v8, %v267_v9  ;;  %v119_v23 = vld [vmem:[#allocation2 + $0x148] sm:$0xff] }
  0x57   :  { %v178_v27 = vld [vmem:[#allocation2 + $0x320] sm:$0xff]  ;;  %1649 = vmatpush2.bf16.msra.mxu0 %v4639_v30  ;;  %v123_v24 = vld [vmem:[#allocation2 + $0x168] sm:$0xff]  ;;  %v4713_v54 = vcombine.low %v255_v17, %v259_v18 }
  0x58   :  { %v302_v28 = vld [vmem:[#allocation2 + $0x700] sm:$0xff]  ;;  %v4632_v32 = vcombine.high %v174_v26, %v178_v27  ;;  %1689 = vmatprep.subr.bf16.mxu1 %v4768_v25  ;;  %v4631_v38 = vcombine.low %v174_v26, %v178_v27  ;;  %v247_v25 = vld [vmem:[#allocation2 + $0x548] sm:$0xff]  ;;  %v4714_v26 = vcombine.high %v255_v17, %v259_v18 }
  0x59   :  { %v306_v29 = vld [vmem:[#allocation2 + $0x720] sm:$0xff]  ;;  %1690 = vmatpush2.bf16.msra.mxu1 %v4767_v31  ;;  %v251_v27 = vld [vmem:[#allocation2 + $0x568] sm:$0xff] }
  0x5a   :  { %v4760_v33 = vcombine.high %v302_v28, %v306_v29  ;;  %v166_v34 = vld [vmem:[#allocation2 + $0x2c0] sm:$0xff]  ;;  %1650 = vmatprep.subr.bf16.mxu0 %v4632_v32  ;;  %v4759_v39 = vcombine.low %v302_v28, %v306_v29  ;;  %v4578_v28 = vcombine.high %v119_v23, %v123_v24  ;;  %v111_v29 = vld [vmem:[#allocation2 + $0x108] sm:$0xff]  ;;  %v4706_v32 = vcombine.high %v247_v25, %v251_v27 }
  0x5b   :  { %v170_v35 = vld [vmem:[#allocation2 + $0x2e0] sm:$0xff]  ;;  %1651 = vmatpush2.bf16.msra.mxu0 %v4631_v38  ;;  %v115_v30 = vld [vmem:[#allocation2 + $0x128] sm:$0xff] }
  0x5c   :  { %v294_v36 = vld [vmem:[#allocation2 + $0x6c0] sm:$0xff]  ;;  %v4624_v40 = vcombine.high %v166_v34, %v170_v35  ;;  %1691 = vmatprep.subr.bf16.mxu1 %v4760_v33  ;;  %v4623_v46 = vcombine.low %v166_v34, %v170_v35  ;;  %v239_v31 = vld [vmem:[#allocation2 + $0x508] sm:$0xff]  ;;  %v4577_v34 = vcombine.low %v119_v23, %v123_v24  ;;  %v4705_v35 = vcombine.low %v247_v25, %v251_v27 }
  0x5d   :  { %v298_v37 = vld [vmem:[#allocation2 + $0x6e0] sm:$0xff]  ;;  %1692 = vmatpush2.bf16.msra.mxu1 %v4759_v39  ;;  %v243_v33 = vld [vmem:[#allocation2 + $0x528] sm:$0xff] }
  0x5e   :  { %v4752_v41 = vcombine.high %v294_v36, %v298_v37  ;;  %v158_v42 = vld [vmem:[#allocation2 + $0x280] sm:$0xff]  ;;  %1652 = vmatprep.subr.bf16.mxu0 %v4624_v40  ;;  %v4751_v47 = vcombine.low %v294_v36, %v298_v37  ;;  %v4570_v36 = vcombine.high %v111_v29, %v115_v30  ;;  %v103_v37 = vld [vmem:[#allocation2 + $0xc8] sm:$0xff]  ;;  %v4698_v40 = vcombine.high %v239_v31, %v243_v33 }
  0x5f   :  { %v162_v43 = vld [vmem:[#allocation2 + $0x2a0] sm:$0xff]  ;;  %1653 = vmatpush2.bf16.msra.mxu0 %v4623_v46  ;;  %v107_v38 = vld [vmem:[#allocation2 + $0xe8] sm:$0xff] }
  0x60   :  { %v286_v44 = vld [vmem:[#allocation2 + $0x680] sm:$0xff]  ;;  %v4616_v48 = vcombine.high %v158_v42, %v162_v43  ;;  %1693 = vmatprep.subr.bf16.mxu1 %v4752_v41  ;;  %v4615_v56 = vcombine.low %v158_v42, %v162_v43  ;;  %v231_v39 = vld [vmem:[#allocation2 + $0x4c8] sm:$0xff]  ;;  %v4569_v42 = vcombine.low %v111_v29, %v115_v30  ;;  %v4697_v43 = vcombine.low %v239_v31, %v243_v33 }
  0x61   :  { %v290_v45 = vld [vmem:[#allocation2 + $0x6a0] sm:$0xff]  ;;  %1694 = vmatpush2.bf16.msra.mxu1 %v4751_v47  ;;  %v235_v41 = vld [vmem:[#allocation2 + $0x4e8] sm:$0xff] }
  0x62   :  { %v4744_v49 = vcombine.high %v286_v44, %v290_v45  ;;  %v150_v50 = vld [vmem:[#allocation2 + $0x240] sm:$0xff]  ;;  %1654 = vmatprep.subr.bf16.mxu0 %v4616_v48  ;;  %v4743_v57 = vcombine.low %v286_v44, %v290_v45  ;;  %v4562_v44 = vcombine.high %v103_v37, %v107_v38  ;;  %v95_v45 = vld [vmem:[#allocation2 + $0x88] sm:$0xff]  ;;  %v4690_v48 = vcombine.high %v231_v39, %v235_v41 }
  0x63   :  { %v154_v51 = vld [vmem:[#allocation2 + $0x260] sm:$0xff]  ;;  %1655 = vmatpush2.bf16.msra.mxu0 %v4615_v56  ;;  %v99_v46 = vld [vmem:[#allocation2 + $0xa8] sm:$0xff] }
  0x64   :  { %v278_v52 = vld [vmem:[#allocation2 + $0x640] sm:$0xff]  ;;  %v4608_v60 = vcombine.high %v150_v50, %v154_v51  ;;  %1695 = vmatprep.subr.bf16.mxu1 %v4744_v49  ;;  %v4607_v2 = vcombine.low %v150_v50, %v154_v51  ;;  %v223_v47 = vld [vmem:[#allocation2 + $0x488] sm:$0xff]  ;;  %v4561_v50 = vcombine.low %v103_v37, %v107_v38  ;;  %v4689_v51 = vcombine.low %v231_v39, %v235_v41 }
  0x65   :  { %v282_v55 = vld [vmem:[#allocation2 + $0x660] sm:$0xff]  ;;  %1696 = vmatpush2.bf16.msra.mxu1 %v4743_v57  ;;  %v227_v49 = vld [vmem:[#allocation2 + $0x4a8] sm:$0xff] }
  0x66   :  { %v4736_v61 = vcombine.high %v278_v52, %v282_v55  ;;  %v142_v62 = vld [vmem:[#allocation2 + $0x200] sm:$0xff]  ;;  %1656 = vmatprep.subr.bf16.mxu0 %v4608_v60  ;;  %v4735_v3 = vcombine.low %v278_v52, %v282_v55  ;;  %v4554_v52 = vcombine.high %v95_v45, %v99_v46  ;;  %v87_v55 = vld [vmem:[#allocation2 + $0x48] sm:$0xff]  ;;  %v4682_v60 = vcombine.high %v223_v47, %v227_v49 }
  0x67   :  { %v146_v63 = vld [vmem:[#allocation2 + $0x220] sm:$0xff]  ;;  %1657 = vmatpush2.bf16.msra.mxu0 %v4607_v2  ;;  %v91_v56 = vld [vmem:[#allocation2 + $0x68] sm:$0xff] }
  0x68   :  { %v270_v0 = vld [vmem:[#allocation2 + $0x600] sm:$0xff]  ;;  %v4600_v4 = vcombine.high %v142_v62, %v146_v63  ;;  %1697 = vmatprep.subr.bf16.mxu1 %v4736_v61  ;;  %v4599_v10 = vcombine.low %v142_v62, %v146_v63  ;;  %v215_v57 = vld [vmem:[#allocation2 + $0x448] sm:$0xff]  ;;  %v4553_v62 = vcombine.low %v95_v45, %v99_v46  ;;  %v4681_v63 = vcombine.low %v223_v47, %v227_v49 }
  0x69   :  { %v274_v1 = vld [vmem:[#allocation2 + $0x620] sm:$0xff]  ;;  %1698 = vmatpush2.bf16.msra.mxu1 %v4735_v3  ;;  %v219_v61 = vld [vmem:[#allocation2 + $0x468] sm:$0xff]  ;;  %v4545_v6 = vcombine.low %v87_v55, %v91_v56 }
  0x6a   :  { %v4728_v5 = vcombine.high %v270_v0, %v274_v1  ;;  %1658 = vmatprep.subr.bf16.mxu0 %v4600_v4  ;;  %v4727_v11 = vcombine.low %v270_v0, %v274_v1  ;;  %v4546_v0 = vcombine.high %v87_v55, %v91_v56  ;;  %v79_v1 = vld [vmem:[#allocation2 + $0x8] sm:$0xff]  ;;  %v4674_v4 = vcombine.high %v215_v57, %v219_v61 }
  0x6b   :  { %1659 = vmatpush2.bf16.msra.mxu0 %v4599_v10  ;;  %v83_v2 = vld [vmem:[#allocation2 + $0x28] sm:$0xff]  ;;  %v4673_v7 = vcombine.low %v215_v57, %v219_v61 }
  0x6c   :  { %1699 = vmatprep.subr.bf16.mxu1 %v4728_v5  ;;  %1710 = vmatprep.subr.bf16.mxu0 %v4594_v12  ;;  %v207_v3 = vld [vmem:[#allocation2 + $0x408] sm:$0xff]  ;;  %v4538_v8 = vcombine.high %v79_v1, %v83_v2  ;;  %v4537_v14 = vcombine.low %v79_v1, %v83_v2 }
  0x6d   :  { %1700 = vmatpush2.bf16.msra.mxu1 %v4727_v11  ;;  %v211_v5 = vld [vmem:[#allocation2 + $0x428] sm:$0xff] }
  0x6e   :  { %1751 = vmatprep.subr.bf16.mxu1 %v4722_v13  ;;  %1661 = vmatmul.mubr.bf16.vlgmr.msra.gmra.mxu0 %v5810_v16  ;;  %v199_v9 = vld [vmem:[#allocation2 + $0x3c8] sm:$0xff]  ;;  %v4666_v12 = vcombine.high %v207_v3, %v211_v5  ;;  %v4665_v15 = vcombine.low %v207_v3, %v211_v5 }
  0x6f   :  { %1711 = vmatpush1.bf16.msra.mxu0 %v4593_v20  ;;  %1742 = vmatprep.mubr.bf16.mxu0 %v5800_v58  ;;  %v203_v10 = vld [vmem:[#allocation2 + $0x3e8] sm:$0xff] }
  0x70   :  { %1702 = vmatmul.mubr.bf16.vlgmr.msra.gmra.mxu1 %v5814_v19  ;;  %1712 = vmatprep.subr.bf16.mxu0 %v4586_v22  ;;  %v327_v11 = vld [vmem:[#allocation2 + $0x7c8] sm:$0xff]  ;;  %v4658_v17 = vcombine.high %v199_v9, %v203_v10  ;;  %v4657_v24 = vcombine.low %v199_v9, %v203_v10 }
  0x71   :  { %1752 = vmatpush1.bf16.msra.mxu1 %v4721_v21  ;;  %1783 = vmatprep.mubr.bf16.mxu1 %v5804_v59  ;;  %v331_v13 = vld [vmem:[#allocation2 + $0x7e8] sm:$0xff] }
  0x72   :  { %1753 = vmatprep.subr.bf16.mxu1 %v4714_v26  ;;  %v191_v18 = vld [vmem:[#allocation2 + $0x388] sm:$0xff]  ;;  %v4786_v22 = vcombine.high %v327_v11, %v331_v13  ;;  %v4785_v25 = vcombine.low %v327_v11, %v331_v13  ;;  %v136_v13 = vld [vmem:[#allocation2 + $0x1d0] sm:$0xff] }
  0x73   :  { %1713 = vmatpush1.bf16.msra.mxu0 %v4585_v53  ;;  %v195_v20 = vld [vmem:[#allocation2 + $0x3a8] sm:$0xff] }
  0x74   :  { %1714 = vmatprep.subr.bf16.mxu0 %v4578_v28  ;;  %v319_v21 = vld [vmem:[#allocation2 + $0x788] sm:$0xff]  ;;  %v4650_v26 = vcombine.high %v191_v18, %v195_v20  ;;  %v4649_v30 = vcombine.low %v191_v18, %v195_v20  ;;  %v268_v18 = vld [vmem:[#allocation2 + $0x5f0] sm:$0xff] }
  0x75   :  { %1754 = vmatpush1.bf16.msra.mxu1 %v4713_v54  ;;  %v323_v23 = vld [vmem:[#allocation2 + $0x7a8] sm:$0xff] }
  0x76   :  { %1755 = vmatprep.subr.bf16.mxu1 %v4706_v32  ;;  %v183_v27 = vld [vmem:[#allocation2 + $0x348] sm:$0xff]  ;;  %v4778_v28 = vcombine.high %v319_v21, %v323_v23  ;;  %v4777_v31 = vcombine.low %v319_v21, %v323_v23  ;;  %v128_v23 = vld [vmem:[#allocation2 + $0x190] sm:$0xff] }
  0x77   :  { %1715 = vmatpush1.bf16.msra.mxu0 %v4577_v34  ;;  %v187_v53 = vld [vmem:[#allocation2 + $0x368] sm:$0xff] }
  0x78   :  { %1716 = vmatprep.subr.bf16.mxu0 %v4570_v36  ;;  %v311_v54 = vld [vmem:[#allocation2 + $0x748] sm:$0xff]  ;;  %v4642_v32 = vcombine.high %v183_v27, %v187_v53  ;;  %v4641_v38 = vcombine.low %v183_v27, %v187_v53  ;;  %v260_v27 = vld [vmem:[#allocation2 + $0x5b0] sm:$0xff] }
  0x79   :  { %1756 = vmatpush1.bf16.msra.mxu1 %v4705_v35  ;;  %v315_v29 = vld [vmem:[#allocation2 + $0x768] sm:$0xff] }
  0x7a   :  { %1757 = vmatprep.subr.bf16.mxu1 %v4698_v40  ;;  %v175_v33 = vld [vmem:[#allocation2 + $0x308] sm:$0xff]  ;;  %v4770_v36 = vcombine.high %v311_v54, %v315_v29  ;;  %v4769_v39 = vcombine.low %v311_v54, %v315_v29  ;;  %v120_v54 = vld [vmem:[#allocation2 + $0x150] sm:$0xff] }
  0x7b   :  { %1717 = vmatpush1.bf16.msra.mxu0 %v4569_v42  ;;  %v179_v34 = vld [vmem:[#allocation2 + $0x328] sm:$0xff] }
  0x7c   :  { %1718 = vmatprep.subr.bf16.mxu0 %v4562_v44  ;;  %v303_v35 = vld [vmem:[#allocation2 + $0x708] sm:$0xff]  ;;  %v4634_v40 = vcombine.high %v175_v33, %v179_v34  ;;  %v4633_v46 = vcombine.low %v175_v33, %v179_v34  ;;  %v252_v33 = vld [vmem:[#allocation2 + $0x570] sm:$0xff] }
  0x7d   :  { %1758 = vmatpush1.bf16.msra.mxu1 %v4697_v43  ;;  %v307_v37 = vld [vmem:[#allocation2 + $0x728] sm:$0xff] }
  0x7e   :  { %1759 = vmatprep.subr.bf16.mxu1 %v4690_v48  ;;  %v167_v41 = vld [vmem:[#allocation2 + $0x2c8] sm:$0xff]  ;;  %v4762_v44 = vcombine.high %v303_v35, %v307_v37  ;;  %v4761_v47 = vcombine.low %v303_v35, %v307_v37  ;;  %v112_v35 = vld [vmem:[#allocation2 + $0x110] sm:$0xff] }
  0x7f   :  { %1719 = vmatpush1.bf16.msra.mxu0 %v4561_v50  ;;  %v171_v42 = vld [vmem:[#allocation2 + $0x2e8] sm:$0xff] }
  0x80   :  { %1720 = vmatprep.subr.bf16.mxu0 %v4554_v52  ;;  %v295_v43 = vld [vmem:[#allocation2 + $0x6c8] sm:$0xff]  ;;  %v4626_v48 = vcombine.high %v167_v41, %v171_v42  ;;  %v4625_v56 = vcombine.low %v167_v41, %v171_v42  ;;  %v244_v41 = vld [vmem:[#allocation2 + $0x530] sm:$0xff] }
  0x81   :  { %1760 = vmatpush1.bf16.msra.mxu1 %v4689_v51  ;;  %v299_v45 = vld [vmem:[#allocation2 + $0x6e8] sm:$0xff] }
  0x82   :  { %1761 = vmatprep.subr.bf16.mxu1 %v4682_v60  ;;  %v159_v49 = vld [vmem:[#allocation2 + $0x288] sm:$0xff]  ;;  %v4754_v52 = vcombine.high %v295_v43, %v299_v45  ;;  %v4753_v57 = vcombine.low %v295_v43, %v299_v45  ;;  %v104_v43 = vld [vmem:[#allocation2 + $0xd0] sm:$0xff] }
  0x83   :  { %1721 = vmatpush1.bf16.msra.mxu0 %v4553_v62  ;;  %v163_v50 = vld [vmem:[#allocation2 + $0x2a8] sm:$0xff] }
  0x84   :  { %1722 = vmatprep.subr.bf16.mxu0 %v4546_v0  ;;  %v287_v51 = vld [vmem:[#allocation2 + $0x688] sm:$0xff]  ;;  %v4618_v60 = vcombine.high %v159_v49, %v163_v50  ;;  %v4617_v2 = vcombine.low %v159_v49, %v163_v50  ;;  %v236_v49 = vld [vmem:[#allocation2 + $0x4f0] sm:$0xff] }
  0x85   :  { %1762 = vmatpush1.bf16.msra.mxu1 %v4681_v63  ;;  %v291_v55 = vld [vmem:[#allocation2 + $0x6a8] sm:$0xff] }
  0x86   :  { %1763 = vmatprep.subr.bf16.mxu1 %v4674_v4  ;;  %v151_v61 = vld [vmem:[#allocation2 + $0x248] sm:$0xff]  ;;  %v4746_v0 = vcombine.high %v287_v51, %v291_v55  ;;  %v4745_v3 = vcombine.low %v287_v51, %v291_v55  ;;  %v96_v51 = vld [vmem:[#allocation2 + $0x90] sm:$0xff] }
  0x87   :  { %1723 = vmatpush1.bf16.msra.mxu0 %v4545_v6  ;;  %v155_v62 = vld [vmem:[#allocation2 + $0x268] sm:$0xff] }
  0x88   :  { %1724 = vmatprep.subr.bf16.mxu0 %v4538_v8  ;;  %v279_v63 = vld [vmem:[#allocation2 + $0x648] sm:$0xff]  ;;  %v4610_v4 = vcombine.high %v151_v61, %v155_v62  ;;  %v4609_v10 = vcombine.low %v151_v61, %v155_v62  ;;  %v228_v61 = vld [vmem:[#allocation2 + $0x4b0] sm:$0xff] }
  0x89   :  { %1764 = vmatpush1.bf16.msra.mxu1 %v4673_v7  ;;  %v283_v1 = vld [vmem:[#allocation2 + $0x668] sm:$0xff] }
  0x8a   :  { %1765 = vmatprep.subr.bf16.mxu1 %v4666_v12  ;;  %v143_v5 = vld [vmem:[#allocation2 + $0x208] sm:$0xff]  ;;  %v4738_v8 = vcombine.high %v279_v63, %v283_v1  ;;  %v4737_v11 = vcombine.low %v279_v63, %v283_v1  ;;  %v88_v63 = vld [vmem:[#allocation2 + $0x50] sm:$0xff] }
  0x8b   :  { %1725 = vmatpush1.bf16.msra.mxu0 %v4537_v14  ;;  %v147_v6 = vld [vmem:[#allocation2 + $0x228] sm:$0xff]  ;;  %v140_v14 = vld [vmem:[#allocation2 + $0x1f0] sm:$0xff] }
  0x8c   :  { %1726 = vmatprep.subr.bf16.mxu0 %v4658_v17  ;;  %v271_v7 = vld [vmem:[#allocation2 + $0x608] sm:$0xff]  ;;  %v4602_v12 = vcombine.high %v143_v5, %v147_v6  ;;  %v4601_v20 = vcombine.low %v143_v5, %v147_v6  ;;  %v4595_v53 = vcombine.low %v136_v13, %v140_v14  ;;  %v220_v5 = vld [vmem:[#allocation2 + $0x470] sm:$0xff] }
  0x8d   :  { %1766 = vmatpush1.bf16.msra.mxu1 %v4665_v15  ;;  %v275_v9 = vld [vmem:[#allocation2 + $0x628] sm:$0xff]  ;;  %v264_v15 = vld [vmem:[#allocation2 + $0x5d0] sm:$0xff] }
  0x8e   :  { %1767 = vmatprep.subr.bf16.mxu1 %v4786_v22  ;;  %v4730_v17 = vcombine.high %v271_v7, %v275_v9  ;;  %v4729_v21 = vcombine.low %v271_v7, %v275_v9  ;;  %v4596_v22 = vcombine.high %v136_v13, %v140_v14  ;;  %v4723_v29 = vcombine.low %v264_v15, %v268_v18  ;;  %v80_v7 = vld [vmem:[#allocation2 + $0x10] sm:$0xff] }
  0x8f   :  { %1727 = vmatpush2.bf16.msra.mxu0 %v4657_v24  ;;  %v132_v24 = vld [vmem:[#allocation2 + $0x1b0] sm:$0xff] }
  0x90   :  { %1728 = vmatprep.subr.bf16.mxu0 %v4650_v26  ;;  %v4724_v26 = vcombine.high %v264_v15, %v268_v18  ;;  %v4587_v34 = vcombine.low %v128_v23, %v132_v24  ;;  %v212_v13 = vld [vmem:[#allocation2 + $0x430] sm:$0xff] }
  0x91   :  { %1768 = vmatpush2.bf16.msra.mxu1 %v4785_v25  ;;  %v256_v25 = vld [vmem:[#allocation2 + $0x590] sm:$0xff] }
  0x92   :  { %1769 = vmatprep.subr.bf16.mxu1 %v4778_v28  ;;  %v124_v28 = vld [vmem:[#allocation2 + $0x170] sm:$0xff]  ;;  %v4715_v37 = vcombine.low %v256_v25, %v260_v27 }
  0x93   :  { %1729 = vmatpush2.bf16.msra.mxu0 %v4649_v30  ;;  %v4588_v30 = vcombine.high %v128_v23, %v132_v24  ;;  %v4579_v42 = vcombine.low %v120_v54, %v124_v28  ;;  %v200_v15 = vld [vmem:[#allocation2 + $0x3d0] sm:$0xff] }
  0x94   :  { %1730 = vmatprep.subr.bf16.mxu0 %v4642_v32  ;;  %v248_v32 = vld [vmem:[#allocation2 + $0x550] sm:$0xff] }
  0x95   :  { %1770 = vmatpush2.bf16.msra.mxu1 %v4777_v31  ;;  %v4716_v31 = vcombine.high %v256_v25, %v260_v27  ;;  %v4707_v45 = vcombine.low %v248_v32, %v252_v33  ;;  %v332_v23 = vld [vmem:[#allocation2 + $0x7f0] sm:$0xff] }
  0x96   :  { %1771 = vmatprep.subr.bf16.mxu1 %v4770_v36  ;;  %v116_v36 = vld [vmem:[#allocation2 + $0x130] sm:$0xff] }
  0x97   :  { %1731 = vmatpush2.bf16.msra.mxu0 %v4641_v38  ;;  %v4580_v38 = vcombine.high %v120_v54, %v124_v28  ;;  %v4571_v50 = vcombine.low %v112_v35, %v116_v36  ;;  %v192_v25 = vld [vmem:[#allocation2 + $0x390] sm:$0xff] }
  0x98   :  { %1732 = vmatprep.subr.bf16.mxu0 %v4634_v40  ;;  %v240_v40 = vld [vmem:[#allocation2 + $0x510] sm:$0xff] }
  0x99   :  { %1772 = vmatpush2.bf16.msra.mxu1 %v4769_v39  ;;  %v4708_v39 = vcombine.high %v248_v32, %v252_v33  ;;  %v4699_v55 = vcombine.low %v240_v40, %v244_v41  ;;  %v320_v54 = vld [vmem:[#allocation2 + $0x790] sm:$0xff] }
  0x9a   :  { %1773 = vmatprep.subr.bf16.mxu1 %v4762_v44  ;;  %v108_v44 = vld [vmem:[#allocation2 + $0xf0] sm:$0xff] }
  0x9b   :  { %1733 = vmatpush2.bf16.msra.mxu0 %v4633_v46  ;;  %v4572_v46 = vcombine.high %v112_v35, %v116_v36  ;;  %v4563_v62 = vcombine.low %v104_v43, %v108_v44  ;;  %v324_v28 = vld [vmem:[#allocation2 + $0x7b0] sm:$0xff] }
  0x9c   :  { %1734 = vmatprep.subr.bf16.mxu0 %v4626_v48  ;;  %v232_v48 = vld [vmem:[#allocation2 + $0x4d0] sm:$0xff] }
  0x9d   :  { %1774 = vmatpush2.bf16.msra.mxu1 %v4761_v47  ;;  %v4700_v47 = vcombine.high %v240_v40, %v244_v41  ;;  %v4691_v1 = vcombine.low %v232_v48, %v236_v49  ;;  %v184_v33 = vld [vmem:[#allocation2 + $0x350] sm:$0xff]  ;;  %v4779_v41 = vcombine.low %v320_v54, %v324_v28 }
  0x9e   :  { %1775 = vmatprep.subr.bf16.mxu1 %v4754_v52  ;;  %v100_v52 = vld [vmem:[#allocation2 + $0xb0] sm:$0xff] }
  0x9f   :  { %1735 = vmatpush2.bf16.msra.mxu0 %v4625_v56  ;;  %v4564_v56 = vcombine.high %v104_v43, %v108_v44  ;;  %v4555_v6 = vcombine.low %v96_v51, %v100_v52  ;;  %v188_v35 = vld [vmem:[#allocation2 + $0x370] sm:$0xff] }
  0xa0   :  { %1736 = vmatprep.subr.bf16.mxu0 %v4618_v60  ;;  %v224_v60 = vld [vmem:[#allocation2 + $0x490] sm:$0xff] }
  0xa1   :  { %1776 = vmatpush2.bf16.msra.mxu1 %v4753_v57  ;;  %v4692_v57 = vcombine.high %v232_v48, %v236_v49  ;;  %v4683_v9 = vcombine.low %v224_v60, %v228_v61  ;;  %v312_v36 = vld [vmem:[#allocation2 + $0x750] sm:$0xff] }
  0xa2   :  { %1777 = vmatprep.subr.bf16.mxu1 %v4746_v0  ;;  %v92_v0 = vld [vmem:[#allocation2 + $0x70] sm:$0xff] }
  0xa3   :  { %1737 = vmatpush2.bf16.msra.mxu0 %v4617_v2  ;;  %v4556_v2 = vcombine.high %v96_v51, %v100_v52  ;;  %v4547_v14 = vcombine.low %v88_v63, %v92_v0  ;;  %v180_v40 = vld [vmem:[#allocation2 + $0x330] sm:$0xff] }
  0xa4   :  { %1738 = vmatprep.subr.bf16.mxu0 %v4610_v4  ;;  %v216_v4 = vld [vmem:[#allocation2 + $0x450] sm:$0xff] }
  0xa5   :  { %1778 = vmatpush2.bf16.msra.mxu1 %v4745_v3  ;;  %v4684_v3 = vcombine.high %v224_v60, %v228_v61  ;;  %v4675_v18 = vcombine.low %v216_v4, %v220_v5  ;;  %v304_v43 = vld [vmem:[#allocation2 + $0x710] sm:$0xff] }
  0xa6   :  { %1779 = vmatprep.subr.bf16.mxu1 %v4738_v8  ;;  %v84_v8 = vld [vmem:[#allocation2 + $0x30] sm:$0xff] }
  0xa7   :  { %1739 = vmatpush2.bf16.msra.mxu0 %v4609_v10  ;;  %v4548_v10 = vcombine.high %v88_v63, %v92_v0  ;;  %v4539_v24 = vcombine.low %v80_v7, %v84_v8  ;;  %v308_v44 = vld [vmem:[#allocation2 + $0x730] sm:$0xff] }
  0xa8   :  { %1740 = vmatprep.subr.bf16.mxu0 %v4602_v12  ;;  %v208_v12 = vld [vmem:[#allocation2 + $0x410] sm:$0xff]  ;;  %v4763_v61 = vcombine.low %v304_v43, %v308_v44 }
  0xa9   :  { %1780 = vmatpush2.bf16.msra.mxu1 %v4737_v11  ;;  %v4676_v11 = vcombine.high %v216_v4, %v220_v5  ;;  %v4667_v27 = vcombine.low %v208_v12, %v212_v13  ;;  %v172_v48 = vld [vmem:[#allocation2 + $0x2f0] sm:$0xff] }
  0xaa   :  { %1781 = vmatprep.subr.bf16.mxu1 %v4730_v17  ;;  %v204_v17 = vld [vmem:[#allocation2 + $0x3f0] sm:$0xff] }
  0xab   :  { %1741 = vmatpush2.bf16.msra.mxu0 %v4601_v20  ;;  %v4540_v20 = vcombine.high %v80_v7, %v84_v8  ;;  %v296_v51 = vld [vmem:[#allocation2 + $0x6d0] sm:$0xff] }
  0xac   :  { %1792 = vmatprep.subr.bf16.mxu0 %v4596_v22  ;;  %v328_v22 = vld [vmem:[#allocation2 + $0x7d0] sm:$0xff] }
  0xad   :  { %1782 = vmatpush2.bf16.msra.mxu1 %v4729_v21  ;;  %v4668_v21 = vcombine.high %v208_v12, %v212_v13  ;;  %v300_v52 = vld [vmem:[#allocation2 + $0x6f0] sm:$0xff] }
  0xae   :  { %1833 = vmatprep.subr.bf16.mxu1 %v4724_v26  ;;  %1743 = vmatmul.mubr.bf16.vlgmr.msra.gmra.mxu0 %v5810_v16  ;;  %v196_v26 = vld [vmem:[#allocation2 + $0x3b0] sm:$0xff]  ;;  %v4755_v5 = vcombine.low %v296_v51, %v300_v52 }
  0xaf   :  { %1793 = vmatpush1.bf16.msra.mxu0 %v4595_v53  ;;  %1824 = vmatprep.mubr.bf16.mxu0 %v5800_v58  ;;  %v4660_v53 = vcombine.high %v200_v15, %v204_v17  ;;  %v4652_v32 = vcombine.high %v192_v25, %v196_v26  ;;  %v164_v60 = vld [vmem:[#allocation2 + $0x2b0] sm:$0xff] }
  0xb0   :  { %1784 = vmatmul.mubr.bf16.vlgmr.msra.gmra.mxu1 %v5814_v19  ;;  %1794 = vmatprep.subr.bf16.mxu0 %v4588_v30  ;;  %v4659_v30 = vcombine.low %v200_v15, %v204_v17  ;;  %v288_v63 = vld [vmem:[#allocation2 + $0x690] sm:$0xff] }
  0xb1   :  { %1834 = vmatpush1.bf16.msra.mxu1 %v4723_v29  ;;  %1865 = vmatprep.mubr.bf16.mxu1 %v5804_v59  ;;  %v4788_v29 = vcombine.high %v328_v22, %v332_v23  ;;  %v292_v0 = vld [vmem:[#allocation2 + $0x6b0] sm:$0xff] }
  0xb2   :  { %1835 = vmatprep.subr.bf16.mxu1 %v4716_v31  ;;  %v4787_v31 = vcombine.low %v328_v22, %v332_v23  ;;  %v156_v4 = vld [vmem:[#allocation2 + $0x270] sm:$0xff]  ;;  %v4747_v13 = vcombine.low %v288_v63, %v292_v0  ;;  %v141_v22 = vld [vmem:[#allocation2 + $0x1f8] sm:$0xff] }
  0xb3   :  { %1795 = vmatpush1.bf16.msra.mxu0 %v4587_v34  ;;  %v4780_v34 = vcombine.high %v320_v54, %v324_v28  ;;  %v280_v7 = vld [vmem:[#allocation2 + $0x650] sm:$0xff]  ;;  %v129_v54 = vld [vmem:[#allocation2 + $0x198] sm:$0xff] }
  0xb4   :  { %1796 = vmatprep.subr.bf16.mxu0 %v4580_v38  ;;  %v4651_v38 = vcombine.low %v192_v25, %v196_v26  ;;  %v284_v8 = vld [vmem:[#allocation2 + $0x670] sm:$0xff]  ;;  %v265_v25 = vld [vmem:[#allocation2 + $0x5d8] sm:$0xff] }
  0xb5   :  { %1836 = vmatpush1.bf16.msra.mxu1 %v4715_v37  ;;  %v316_v37 = vld [vmem:[#allocation2 + $0x770] sm:$0xff]  ;;  %v4739_v23 = vcombine.low %v280_v7, %v284_v8  ;;  %v269_v26 = vld [vmem:[#allocation2 + $0x5f8] sm:$0xff] }
  0xb6   :  { %1837 = vmatprep.subr.bf16.mxu1 %v4708_v39  ;;  %v176_v39 = vld [vmem:[#allocation2 + $0x310] sm:$0xff]  ;;  %v4771_v49 = vcombine.low %v312_v36, %v316_v37  ;;  %v133_v28 = vld [vmem:[#allocation2 + $0x1b8] sm:$0xff] }
  0xb7   :  { %1797 = vmatpush1.bf16.msra.mxu0 %v4579_v42  ;;  %v4644_v42 = vcombine.high %v184_v33, %v188_v35  ;;  %v148_v12 = vld [vmem:[#allocation2 + $0x230] sm:$0xff] }
  0xb8   :  { %1798 = vmatprep.subr.bf16.mxu0 %v4572_v46  ;;  %v4643_v46 = vcombine.low %v184_v33, %v188_v35  ;;  %v272_v15 = vld [vmem:[#allocation2 + $0x610] sm:$0xff]  ;;  %v4726_v33 = vcombine.high %v265_v25, %v269_v26  ;;  %v121_v35 = vld [vmem:[#allocation2 + $0x158] sm:$0xff] }
  0xb9   :  { %1838 = vmatpush1.bf16.msra.mxu1 %v4707_v45  ;;  %v4772_v45 = vcombine.high %v312_v36, %v316_v37  ;;  %v276_v17 = vld [vmem:[#allocation2 + $0x630] sm:$0xff]  ;;  %v125_v36 = vld [vmem:[#allocation2 + $0x178] sm:$0xff]  ;;  %v4725_v37 = vcombine.low %v265_v25, %v269_v26 }
  0xba   :  { %1839 = vmatprep.subr.bf16.mxu1 %v4700_v47  ;;  %v168_v47 = vld [vmem:[#allocation2 + $0x2d0] sm:$0xff]  ;;  %v201_v25 = vld [vmem:[#allocation2 + $0x3d8] sm:$0xff] }
  0xbb   :  { %1799 = vmatpush1.bf16.msra.mxu0 %v4571_v50  ;;  %v4636_v50 = vcombine.high %v176_v39, %v180_v40 }
  0xbc   :  { %1800 = vmatprep.subr.bf16.mxu0 %v4564_v56  ;;  %v4635_v56 = vcombine.low %v176_v39, %v180_v40  ;;  %v249_v39 = vld [vmem:[#allocation2 + $0x558] sm:$0xff] }
  0xbd   :  { %1840 = vmatpush1.bf16.msra.mxu1 %v4699_v55  ;;  %v4764_v55 = vcombine.high %v304_v43, %v308_v44  ;;  %v253_v40 = vld [vmem:[#allocation2 + $0x578] sm:$0xff] }
  0xbe   :  { %1841 = vmatprep.subr.bf16.mxu1 %v4692_v57  ;;  %v160_v57 = vld [vmem:[#allocation2 + $0x290] sm:$0xff]  ;;  %v113_v43 = vld [vmem:[#allocation2 + $0x118] sm:$0xff] }
  0xbf   :  { %1801 = vmatpush1.bf16.msra.mxu0 %v4563_v62  ;;  %v4628_v62 = vcombine.high %v168_v47, %v172_v48  ;;  %v117_v44 = vld [vmem:[#allocation2 + $0x138] sm:$0xff] }
  0xc0   :  { %1802 = vmatprep.subr.bf16.mxu0 %v4556_v2  ;;  %v4627_v2 = vcombine.low %v168_v47, %v172_v48  ;;  %v241_v47 = vld [vmem:[#allocation2 + $0x518] sm:$0xff]  ;;  %v4710_v48 = vcombine.high %v249_v39, %v253_v40 }
  0xc1   :  { %1842 = vmatpush1.bf16.msra.mxu1 %v4691_v1  ;;  %v4756_v1 = vcombine.high %v296_v51, %v300_v52  ;;  %v105_v51 = vld [vmem:[#allocation2 + $0xd8] sm:$0xff] }
  0xc2   :  { %1843 = vmatprep.subr.bf16.mxu1 %v4684_v3  ;;  %v152_v3 = vld [vmem:[#allocation2 + $0x250] sm:$0xff]  ;;  %v109_v52 = vld [vmem:[#allocation2 + $0xf8] sm:$0xff] }
  0xc3   :  { %1803 = vmatpush1.bf16.msra.mxu0 %v4555_v6  ;;  %v4620_v6 = vcombine.high %v160_v57, %v164_v60 }
  0xc4   :  { %1804 = vmatprep.subr.bf16.mxu0 %v4548_v10  ;;  %v4619_v10 = vcombine.low %v160_v57, %v164_v60  ;;  %v233_v57 = vld [vmem:[#allocation2 + $0x4d8] sm:$0xff] }
  0xc5   :  { %1844 = vmatpush1.bf16.msra.mxu1 %v4683_v9  ;;  %v4748_v9 = vcombine.high %v288_v63, %v292_v0  ;;  %v97_v63 = vld [vmem:[#allocation2 + $0x98] sm:$0xff] }
  0xc6   :  { %1845 = vmatprep.subr.bf16.mxu1 %v4676_v11  ;;  %v144_v11 = vld [vmem:[#allocation2 + $0x210] sm:$0xff]  ;;  %v101_v0 = vld [vmem:[#allocation2 + $0xb8] sm:$0xff] }
  0xc7   :  { %1805 = vmatpush1.bf16.msra.mxu0 %v4547_v14  ;;  %v4612_v14 = vcombine.high %v152_v3, %v156_v4 }
  0xc8   :  { %1806 = vmatprep.subr.bf16.mxu0 %v4540_v20  ;;  %v4611_v20 = vcombine.low %v152_v3, %v156_v4  ;;  %v229_v3 = vld [vmem:[#allocation2 + $0x4b8] sm:$0xff]  ;;  %v4565_v4 = vcombine.low %v105_v51, %v109_v52 }
  0xc9   :  { %1846 = vmatpush1.bf16.msra.mxu1 %v4675_v18  ;;  %v4740_v18 = vcombine.high %v280_v7, %v284_v8  ;;  %v4558_v8 = vcombine.high %v97_v63, %v101_v0 }
  0xca   :  { %1847 = vmatprep.subr.bf16.mxu1 %v4668_v21  ;;  %v137_v21 = vld [vmem:[#allocation2 + $0x1d8] sm:$0xff] }
  0xcb   :  { %1807 = vmatpush1.bf16.msra.mxu0 %v4539_v24  ;;  %v4604_v24 = vcombine.high %v144_v11, %v148_v12 }
  0xcc   :  { %1808 = vmatprep.subr.bf16.mxu0 %v4660_v53  ;;  %v4603_v53 = vcombine.low %v144_v11, %v148_v12  ;;  %v221_v11 = vld [vmem:[#allocation2 + $0x478] sm:$0xff]  ;;  %v4557_v12 = vcombine.low %v97_v63, %v101_v0  ;;  %v5725_v0 = vmov 1966171168  }
  0xcd   :  { %1848 = vmatpush1.bf16.msra.mxu1 %v4667_v27  ;;  %v4732_v27 = vcombine.high %v272_v15, %v276_v17  ;;  %v301_v63 = vld [vmem:[#allocation2 + $0x6f8] sm:$0xff] }
  0xce   :  { %1849 = vmatprep.subr.bf16.mxu1 %v4788_v29  ;;  %v4731_v29 = vcombine.low %v272_v15, %v276_v17 }
  0xcf   :  { %1809 = vmatpush2.bf16.msra.mxu0 %v4659_v30  ;;  %v4598_v30 = vcombine.high %v137_v21, %v141_v22 }
  0xd0   :  { %1810 = vmatprep.subr.bf16.mxu0 %v4652_v32  ;;  %v261_v32 = vld [vmem:[#allocation2 + $0x5b8] sm:$0xff] }
  0xd1   :  { %1850 = vmatpush2.bf16.msra.mxu1 %v4787_v31  ;;  %v257_v31 = vld [vmem:[#allocation2 + $0x598] sm:$0xff] }
  0xd2   :  { %1851 = vmatprep.subr.bf16.mxu1 %v4780_v34  ;;  %v4597_v34 = vcombine.low %v137_v21, %v141_v22  ;;  %v213_v21 = vld [vmem:[#allocation2 + $0x438] sm:$0xff] }
  0xd3   :  { %1811 = vmatpush2.bf16.msra.mxu0 %v4651_v38  ;;  %v4590_v38 = vcombine.high %v129_v54, %v133_v28 }
  0xd4   :  { %1812 = vmatprep.subr.bf16.mxu0 %v4644_v42  ;;  %v4589_v42 = vcombine.low %v129_v54, %v133_v28  ;;  %v333_v54 = vld [vmem:[#allocation2 + $0x7f8] sm:$0xff] }
  0xd5   :  { %1852 = vmatpush2.bf16.msra.mxu1 %v4779_v41  ;;  %v4718_v41 = vcombine.high %v257_v31, %v261_v32 }
  0xd6   :  { %1853 = vmatprep.subr.bf16.mxu1 %v4772_v45  ;;  %v4717_v45 = vcombine.low %v257_v31, %v261_v32  ;;  %v193_v32 = vld [vmem:[#allocation2 + $0x398] sm:$0xff] }
  0xd7   :  { %1813 = vmatpush2.bf16.msra.mxu0 %v4643_v46  ;;  %v4582_v46 = vcombine.high %v121_v35, %v125_v36 }
  0xd8   :  { %1814 = vmatprep.subr.bf16.mxu0 %v4636_v50  ;;  %v4581_v50 = vcombine.low %v121_v35, %v125_v36  ;;  %v325_v35 = vld [vmem:[#allocation2 + $0x7b8] sm:$0xff] }
  0xd9   :  { %1854 = vmatpush2.bf16.msra.mxu1 %v4771_v49  ;;  %v245_v49 = vld [vmem:[#allocation2 + $0x538] sm:$0xff] }
  0xda   :  { %1855 = vmatprep.subr.bf16.mxu1 %v4764_v55  ;;  %v4709_v55 = vcombine.low %v249_v39, %v253_v40  ;;  %v4702_v60 = vcombine.high %v241_v47, %v245_v49  ;;  %v185_v40 = vld [vmem:[#allocation2 + $0x358] sm:$0xff] }
  0xdb   :  { %1815 = vmatpush2.bf16.msra.mxu0 %v4635_v56  ;;  %v4574_v56 = vcombine.high %v113_v43, %v117_v44 }
  0xdc   :  { %1816 = vmatprep.subr.bf16.mxu0 %v4628_v62  ;;  %v4573_v62 = vcombine.low %v113_v43, %v117_v44  ;;  %v317_v43 = vld [vmem:[#allocation2 + $0x778] sm:$0xff] }
  0xdd   :  { %1856 = vmatpush2.bf16.msra.mxu1 %v4763_v61  ;;  %v237_v61 = vld [vmem:[#allocation2 + $0x4f8] sm:$0xff] }
  0xde   :  { %1857 = vmatprep.subr.bf16.mxu1 %v4756_v1  ;;  %v225_v1 = vld [vmem:[#allocation2 + $0x498] sm:$0xff]  ;;  %v4693_v7 = vcombine.low %v233_v57, %v237_v61 }
  0xdf   :  { %1817 = vmatpush2.bf16.msra.mxu0 %v4627_v2  ;;  %v4694_v2 = vcombine.high %v233_v57, %v237_v61  ;;  %v4685_v15 = vcombine.low %v225_v1, %v229_v3  ;;  %v173_v61 = vld [vmem:[#allocation2 + $0x2f8] sm:$0xff] }
  0xe0   :  { %1818 = vmatprep.subr.bf16.mxu0 %v4620_v6  ;;  %v93_v6 = vld [vmem:[#allocation2 + $0x78] sm:$0xff] }
  0xe1   :  { %1858 = vmatpush2.bf16.msra.mxu1 %v4755_v5  ;;  %v89_v5 = vld [vmem:[#allocation2 + $0x58] sm:$0xff] }
  0xe2   :  { %1859 = vmatprep.subr.bf16.mxu1 %v4748_v9  ;;  %v217_v9 = vld [vmem:[#allocation2 + $0x458] sm:$0xff]  ;;  %v4550_v17 = vcombine.high %v89_v5, %v93_v6  ;;  %v4549_v22 = vcombine.low %v89_v5, %v93_v6 }
  0xe3   :  { %1819 = vmatpush2.bf16.msra.mxu0 %v4619_v10  ;;  %v4686_v10 = vcombine.high %v225_v1, %v229_v3  ;;  %v161_v5 = vld [vmem:[#allocation2 + $0x298] sm:$0xff] }
  0xe4   :  { %1820 = vmatprep.subr.bf16.mxu0 %v4612_v14  ;;  %v85_v14 = vld [vmem:[#allocation2 + $0x38] sm:$0xff] }
  0xe5   :  { %1860 = vmatpush2.bf16.msra.mxu1 %v4747_v13  ;;  %v81_v13 = vld [vmem:[#allocation2 + $0x18] sm:$0xff] }
  0xe6   :  { %1861 = vmatprep.subr.bf16.mxu1 %v4740_v18  ;;  %v209_v18 = vld [vmem:[#allocation2 + $0x418] sm:$0xff]  ;;  %v4541_v28 = vcombine.low %v81_v13, %v85_v14 }
  0xe7   :  { %1821 = vmatpush2.bf16.msra.mxu0 %v4611_v20  ;;  %v4678_v20 = vcombine.high %v217_v9, %v221_v11  ;;  %v4670_v26 = vcombine.high %v209_v18, %v213_v21  ;;  %v165_v6 = vld [vmem:[#allocation2 + $0x2b8] sm:$0xff] }
  0xe8   :  { %1822 = vmatprep.subr.bf16.mxu0 %v4604_v24  ;;  %v4542_v24 = vcombine.high %v81_v13, %v85_v14  ;;  %v4622_v13 = vcombine.high %v161_v5, %v165_v6 }
  0xe9   :  { %1862 = vmatpush2.bf16.msra.mxu1 %v4739_v23  ;;  %v4677_v23 = vcombine.low %v217_v9, %v221_v11 }
  0xea   :  { %1863 = vmatprep.subr.bf16.mxu1 %v4732_v27  ;;  %v205_v27 = vld [vmem:[#allocation2 + $0x3f8] sm:$0xff] }
  0xeb   :  { %1823 = vmatpush2.bf16.msra.mxu0 %v4603_v53  ;;  %v329_v53 = vld [vmem:[#allocation2 + $0x7d8] sm:$0xff]  ;;  %v4661_v36 = vcombine.low %v201_v25, %v205_v27 }
  0xec   :  { %1874 = vmatprep.subr.bf16.mxu0 %v4598_v30  ;;  %v4662_v30 = vcombine.high %v201_v25, %v205_v27  ;;  %v4790_v31 = vcombine.high %v329_v53, %v333_v54  ;;  %v145_v27 = vld [vmem:[#allocation2 + $0x218] sm:$0xff] }
  0xed   :  { %1864 = vmatpush2.bf16.msra.mxu1 %v4731_v29  ;;  %v4669_v29 = vcombine.low %v209_v18, %v213_v21  ;;  %v281_v18 = vld [vmem:[#allocation2 + $0x658] sm:$0xff] }
  0xee   :  { %1915 = vmatprep.subr.bf16.mxu1 %v4726_v33  ;;  %1825 = vmatmul.mubr.bf16.vlgmr.msra.gmra.mxu0 %v5810_v16  ;;  %v197_v33 = vld [vmem:[#allocation2 + $0x3b8] sm:$0xff] }
  0xef   :  { %1875 = vmatpush1.bf16.msra.mxu0 %v4597_v34  ;;  %1906 = vmatprep.mubr.bf16.mxu0 %v5800_v58  ;;  %v4701_v58 = vcombine.low %v241_v47, %v245_v49  ;;  %v321_v34 = vld [vmem:[#allocation2 + $0x798] sm:$0xff]  ;;  %v4653_v44 = vcombine.low %v193_v32, %v197_v33 }
  0xf0   :  { %1866 = vmatmul.mubr.bf16.vlgmr.msra.gmra.mxu1 %v5814_v19  ;;  %1876 = vmatprep.subr.bf16.mxu0 %v4590_v38  ;;  %v4654_v38 = vcombine.high %v193_v32, %v197_v33  ;;  %v4782_v39 = vcombine.high %v321_v34, %v325_v35  ;;  %v181_v49 = vld [vmem:[#allocation2 + $0x338] sm:$0xff] }
  0xf1   :  { %1916 = vmatpush1.bf16.msra.mxu1 %v4725_v37  ;;  %1947 = vmatprep.mubr.bf16.mxu1 %v5804_v59  ;;  %v4566_v59 = vcombine.high %v105_v51, %v109_v52  ;;  %v4789_v37 = vcombine.low %v329_v53, %v333_v54  ;;  %v309_v51 = vld [vmem:[#allocation2 + $0x738] sm:$0xff] }
  0xf2   :  { %1917 = vmatprep.subr.bf16.mxu1 %v4718_v41  ;;  %v189_v41 = vld [vmem:[#allocation2 + $0x378] sm:$0xff] }
  0xf3   :  { %1877 = vmatpush1.bf16.msra.mxu0 %v4589_v42  ;;  %v313_v42 = vld [vmem:[#allocation2 + $0x758] sm:$0xff]  ;;  %v4645_v52 = vcombine.low %v185_v40, %v189_v41 }
  0xf4   :  { %1878 = vmatprep.subr.bf16.mxu0 %v4582_v46  ;;  %v4646_v46 = vcombine.high %v185_v40, %v189_v41  ;;  %v4774_v47 = vcombine.high %v313_v42, %v317_v43  ;;  %v149_v53 = vld [vmem:[#allocation2 + $0x238] sm:$0xff]  ;;  %v5179_v40 = vld [vmem:[#allocation5 + $0xe0] ss:$16 sps:$4 sm:$0xff]   ;;  %v5184_v41 = vld [vmem:[#allocation5 + $0xc4] ss:$16 sps:$4 sm:$0xff]  }
  0xf5   :  { %1918 = vmatpush1.bf16.msra.mxu1 %v4717_v45  ;;  %v4781_v45 = vcombine.low %v321_v34, %v325_v35  ;;  %v273_v54 = vld [vmem:[#allocation2 + $0x618] sm:$0xff]  ;;  %v4606_v32 = vcombine.high %v145_v27, %v149_v53  ;;  %v4605_v35 = vcombine.low %v145_v27, %v149_v53  ;;  %v5208_v53 = vld [vmem:[#allocation5 + $0x1e4] ss:$16 sps:$4 sm:$0xff]  }
  0xf6   :  { %1919 = vmatprep.subr.bf16.mxu1 %v4710_v48  ;;  %v177_v48 = vld [vmem:[#allocation2 + $0x318] sm:$0xff] }
  0xf7   :  { %1879 = vmatpush1.bf16.msra.mxu0 %v4581_v50  ;;  %v305_v50 = vld [vmem:[#allocation2 + $0x718] sm:$0xff]  ;;  %v4637_v1 = vcombine.low %v177_v48, %v181_v49 }
  0xf8   :  { %1880 = vmatprep.subr.bf16.mxu0 %v4574_v56  ;;  %v4638_v56 = vcombine.high %v177_v48, %v181_v49  ;;  %v4766_v57 = vcombine.high %v305_v50, %v309_v51  ;;  %v5182_v48 = vld [vmem:[#allocation5 + $0xc0] ss:$16 sps:$4 sm:$0xff]  }
  0xf9   :  { %1920 = vmatpush1.bf16.msra.mxu1 %v4709_v55  ;;  %v4773_v55 = vcombine.low %v313_v42, %v317_v43  ;;  %v5203_v42 = vld [vmem:[#allocation5 + $0x2e0] ss:$16 sps:$4 sm:$0xff]   ;;  %v5211_v43 = vld [vmem:[#allocation5 + $0x2c4] ss:$16 sps:$4 sm:$0xff]  }
  0xfa   :  { %1921 = vmatprep.subr.bf16.mxu1 %v4702_v60  ;;  %v169_v60 = vld [vmem:[#allocation2 + $0x2d8] sm:$0xff] }
  0xfb   :  { %1881 = vmatpush1.bf16.msra.mxu0 %v4573_v62  ;;  %v297_v62 = vld [vmem:[#allocation2 + $0x6d8] sm:$0xff]  ;;  %v4630_v3 = vcombine.high %v169_v60, %v173_v61  ;;  %v4629_v11 = vcombine.low %v169_v60, %v173_v61  ;;  %v5185_v61 = vld [vmem:[#allocation5 + $0xa0] ss:$16 sps:$4 sm:$0xff]  }
  0xfc   :  { %1882 = vmatprep.subr.bf16.mxu0 %v4566_v59  ;;  %v1970_v59 = vlaneseq }
  0xfd   :  { %1922 = vmatpush1.bf16.msra.mxu1 %v4701_v58  ;;  %v1968_v58 = vunpack.c.l.s4 %v5725_v0  ;;  %v5215_v0 = vld [vmem:[#allocation5 + $0x2a0] ss:$16 sps:$4 sm:$0xff]  }
  0xfe   :  { %1923 = vmatprep.subr.bf16.mxu1 %v4694_v2  ;;  %v4765_v2 = vcombine.low %v305_v50, %v309_v51  ;;  %v5187_v50 = vld [vmem:[#allocation5 + $0xa4] ss:$16 sps:$4 sm:$0xff]   ;;  %v5209_v51 = vld [vmem:[#allocation5 + $0x2c0] ss:$16 sps:$4 sm:$0xff]  }
  0xff   :  { %1883 = vmatpush1.bf16.msra.mxu0 %v4565_v4  ;;  %v4758_v4 = vcombine.high %v297_v62, %v301_v63  ;;  %v1969_v9 = vunpack.c.0.s8 %v1968_v58 }
 0x100   :  { %1884 = vmatprep.subr.bf16.mxu0 %v4558_v8  ;;  %v293_v8 = vld [vmem:[#allocation2 + $0x6b8] sm:$0xff] }
 0x101   :  { %1924 = vmatpush1.bf16.msra.mxu1 %v4693_v7  ;;  %v289_v7 = vld [vmem:[#allocation2 + $0x698] sm:$0xff] }
 0x102   :  { %1925 = vmatprep.subr.bf16.mxu1 %v4686_v10  ;;  %v1971_v10 = vshrl.u32 %v1970_v59, 7  ;;  %v4750_v14 = vcombine.high %v289_v7, %v293_v8  ;;  %v5223_v59 = vld [vmem:[#allocation5 + $0x284] ss:$16 sps:$4 sm:$0xff]  }
 0x103   :  { %1885 = vmatpush1.bf16.msra.mxu0 %v4557_v12  ;;  %v4757_v12 = vcombine.low %v297_v62, %v301_v63 }
 0x104   :  { %1886 = vmatprep.subr.bf16.mxu0 %v4550_v17  ;;  %v157_v17 = vld [vmem:[#allocation2 + $0x278] sm:$0xff]  ;;  %v5828_v21 = vsub.s32 %v1969_v9, %v1971_v10  ;;  %v5227_v9 = vld [vmem:[#allocation5 + $0x260] ss:$16 sps:$4 sm:$0xff]  }
 0x105   :  { %1926 = vmatpush1.bf16.msra.mxu1 %v4685_v15  ;;  %v153_v15 = vld [vmem:[#allocation2 + $0x258] sm:$0xff] }
 0x106   :  { %1927 = vmatprep.subr.bf16.mxu1 %v4678_v20  ;;  %v285_v20 = vld [vmem:[#allocation2 + $0x678] sm:$0xff]  ;;  %v4614_v25 = vcombine.high %v153_v15, %v157_v17 }
 0x107   :  { %1887 = vmatpush1.bf16.msra.mxu0 %v4549_v22  ;;  %v4621_v22 = vcombine.low %v161_v5, %v165_v6  ;;  %v5221_v5 = vld [vmem:[#allocation5 + $0x280] ss:$16 sps:$4 sm:$0xff]   ;;  %v5229_v6 = vld [vmem:[#allocation5 + $0x264] ss:$16 sps:$4 sm:$0xff]  }
 0x108   :  { %1888 = vmatprep.subr.bf16.mxu0 %v4542_v24  ;;  %v4749_v24 = vcombine.low %v289_v7, %v293_v8  ;;  %v5191_v7 = vld [vmem:[#allocation5 + $0x60] ss:$16 sps:$4 sm:$0xff]   ;;  %v5196_v8 = vld [vmem:[#allocation5 + $0x44] ss:$16 sps:$4 sm:$0xff]  }
 0x109   :  { %1928 = vmatpush1.bf16.msra.mxu1 %v4677_v23  ;;  %v5833_v23 = vld [vmem:[%s5995_s2] sm:$0xff] }
 0x10a   :  { %1929 = vmatprep.subr.bf16.mxu1 %v4670_v26  ;;  %v4742_v26 = vcombine.high %v281_v18, %v285_v20 }
 0x10b   :  { %1889 = vmatpush1.bf16.msra.mxu0 %v4541_v28  ;;  %v277_v28 = vld [vmem:[#allocation2 + $0x638] sm:$0xff] }
 0x10c   :  { %1890 = vmatprep.subr.bf16.mxu0 %v4662_v30  ;;  %v4613_v30 = vcombine.low %v153_v15, %v157_v17  ;;  %v4734_v33 = vcombine.high %v273_v54, %v277_v28  ;;  %v5197_v17 = vld [vmem:[#allocation5 + $0x20] ss:$16 sps:$4 sm:$0xff]  }
 0x10d   :  { %1930 = vmatpush1.bf16.msra.mxu1 %v4669_v29  ;;  %v5837_v29 = vrot.slane %v5833_v23, %v5828_v21 }
 0x10e   :  { %1931 = vmatprep.subr.bf16.mxu1 %v4790_v31  ;;  %v4741_v31 = vcombine.low %v281_v18, %v285_v20  ;;  %v5202_v18 = vld [vmem:[#allocation5 + $0x4] ss:$16 sps:$4 sm:$0xff]   ;;  %v5239_v20 = vld [vmem:[#allocation5 + $0x220] ss:$16 sps:$4 sm:$0xff]  }
 0x10f   :  { %1891 = vmatpush2.bf16.msra.mxu0 %v4661_v36  ;;  %v1981_v34 = vcombine.high %v5837_v29, %v5837_v29  ;;  %v4733_v36 = vcombine.low %v273_v54, %v277_v28  ;;  %v5857_v15 = vrot.slane %v5837_v29, %v5828_v21  ;;  %v5245_v54 = vld [vmem:[#allocation5 + $0x200] ss:$16 sps:$4 sm:$0xff]   ;;  %v5253_v29 = vld [vmem:[#allocation5 + $0x3e4] ss:$16 sps:$4 sm:$0xff]  }
 0x110   :  { %1892 = vmatprep.subr.bf16.mxu0 %v4654_v38  ;;  %v5205_v38 = vld [vmem:[#allocation5 + $0x2e4] ss:$16 sps:$4 sm:$0xff]  }
 0x111   :  { %1932 = vmatpush2.bf16.msra.mxu1 %v4789_v37  ;;  %v5181_v37 = vld [vmem:[#allocation5 + $0xe4] ss:$16 sps:$4 sm:$0xff]  }
 0x112   :  { %1933 = vmatprep.subr.bf16.mxu1 %v4782_v39  ;;  %v5842_v39 = vrot.slane %v1981_v34, %v5828_v21  ;;  %v5214_v34 = vld [vmem:[#allocation5 + $0x1c4] ss:$16 sps:$4 sm:$0xff]  }
 0x113   :  { %1893 = vmatpush2.bf16.msra.mxu0 %v4653_v44 }
 0x114   :  { %1894 = vmatprep.subr.bf16.mxu0 %v4646_v46  ;;  %v2023_v46 = vpack.i.b16 %v5842_v39, %v5842_v39 }
 0x115   :  { %1934 = vmatpush2.bf16.msra.mxu1 %v4781_v45  ;;  %v5846_v45 = vsub.s32 0, %v1971_v10  ;;  %v5235_v10 = vld [vmem:[#allocation5 + $0x244] ss:$16 sps:$4 sm:$0xff]  }
 0x116   :  { %1935 = vmatprep.subr.bf16.mxu1 %v4774_v47 }
 0x117   :  { %1895 = vmatpush2.bf16.msra.mxu0 %v4645_v52 }
 0x118   :  { %1896 = vmatprep.subr.bf16.mxu0 %v4638_v56 }
 0x119   :  { %1936 = vmatpush2.bf16.msra.mxu1 %v4773_v55  ;;  %v5217_v55 = vld [vmem:[#allocation5 + $0x2a4] ss:$16 sps:$4 sm:$0xff]  }
 0x11a   :  { %1937 = vmatprep.subr.bf16.mxu1 %v4766_v57 }
 0x11b   :  { %1897 = vmatpush2.bf16.msra.mxu0 %v4637_v1 }
 0x11c   :  { %1898 = vmatprep.subr.bf16.mxu0 %v4630_v3 }
 0x11d   :  { %1938 = vmatpush2.bf16.msra.mxu1 %v4765_v2  ;;  %v5188_v2 = vld [vmem:[#allocation5 + $0x80] ss:$16 sps:$4 sm:$0xff]  }
 0x11e   :  { %1939 = vmatprep.subr.bf16.mxu1 %v4758_v4  ;;  %v5193_v4 = vld [vmem:[#allocation5 + $0x64] ss:$16 sps:$4 sm:$0xff]  }
 0x11f   :  { %1899 = vmatpush2.bf16.msra.mxu0 %v4629_v11  ;;  %v5194_v11 = vld [vmem:[#allocation5 + $0x40] ss:$16 sps:$4 sm:$0xff]  }
 0x120   :  { %1900 = vmatprep.subr.bf16.mxu0 %v4622_v13  ;;  %v5233_v13 = vld [vmem:[#allocation5 + $0x240] ss:$16 sps:$4 sm:$0xff]  }
 0x121   :  { %1940 = vmatpush2.bf16.msra.mxu1 %v4757_v12  ;;  %v5199_v12 = vld [vmem:[#allocation5 + $0x24] ss:$16 sps:$4 sm:$0xff]  }
 0x122   :  { %1941 = vmatprep.subr.bf16.mxu1 %v4750_v14  ;;  %v5241_v14 = vld [vmem:[#allocation5 + $0x224] ss:$16 sps:$4 sm:$0xff]  }
 0x123   :  { %1901 = vmatpush2.bf16.msra.mxu0 %v4621_v22  ;;  %v5247_v22 = vld [vmem:[#allocation5 + $0x204] ss:$16 sps:$4 sm:$0xff]  }
 0x124   :  { %1902 = vmatprep.subr.bf16.mxu0 %v4614_v25  ;;  %v2016_v25 = vpack.i.b16 %v5857_v15, %v5857_v15 }
 0x125   :  { %1942 = vmatpush2.bf16.msra.mxu1 %v4749_v24 }
 0x126   :  { %1943 = vmatprep.subr.bf16.mxu1 %v4742_v26  ;;  %v5200_v26 = vld [vmem:[#allocation5] ss:$16 sps:$4 sm:$0xff]  }
 0x127   :  { %1903 = vmatpush2.bf16.msra.mxu0 %v4613_v30 }
 0x128   :  { %1904 = vmatprep.subr.bf16.mxu0 %v4606_v32 }
 0x129   :  { %1944 = vmatpush2.bf16.msra.mxu1 %v4741_v31  ;;  %v2021_v31 = vrot.slane %v2016_v25, %v5846_v45 }
 0x12a   :  { %1945 = vmatprep.subr.bf16.mxu1 %v4734_v33  ;;  %v5206_v33 = vld [vmem:[#allocation5 + $0x1e0] ss:$16 sps:$4 sm:$0xff]  }
 0x12b   :  { %1905 = vmatpush2.bf16.msra.mxu0 %v4605_v35  ;;  %v5251_v35 = vld [vmem:[#allocation5 + $0x3e0] ss:$16 sps:$4 sm:$0xff]  }
 0x12c   :  { %3647 = vmatprep.subr.bf16.mxu0 %v5181_v37 }
 0x12d   :  { %1946 = vmatpush2.bf16.msra.mxu1 %v4733_v36  ;;  %v5256_v36 = vld [vmem:[#allocation5 + $0x3c4] ss:$16 sps:$4 sm:$0xff]  }
 0x12e   :  { %3688 = vmatprep.subr.bf16.mxu1 %v5205_v38  ;;  %v5844_v44 = vpop.f32.mrf.mxu0  ;;  %1907 = vmatmul.mubr.bf16.vlgmr.msra.gmra.mxu0 %v5810_v16  ;;  %v2028_v16 = vrot.slane %v2023_v46, %v5846_v45  ;;  %v5212_v38 = vld [vmem:[#allocation5 + $0x1c0] ss:$16 sps:$4 sm:$0xff]   ;;  %v5226_v46 = vld [vmem:[#allocation5 + $0x184] ss:$16 sps:$4 sm:$0xff]  }
 0x12f   :  { %3648 = vmatpush1.bf16.msra.mxu0 %v5179_v40  ;;  %v5220_v40 = vld [vmem:[#allocation5 + $0x1a4] ss:$16 sps:$4 sm:$0xff]  }
 0x130   :  { %v5851_v47 = vpop.f32.mrf.mxu1  ;;  %1948 = vmatmul.mubr.bf16.vlgmr.msra.gmra.mxu1 %v5814_v19  ;;  %v1664_v49 = vpop.f32.mrf.mxu0  ;;  %3649 = vmatprep.subr.bf16.mxu0 %v5184_v41  ;;  %v5190_v19 = vld [vmem:[#allocation5 + $0x84] ss:$16 sps:$4 sm:$0xff]   ;;  %v5254_v41 = vld [vmem:[#allocation5 + $0x3c0] ss:$16 sps:$4 sm:$0xff]  }
 0x131   :  { %3689 = vmatpush1.bf16.msra.mxu1 %v5203_v42  ;;  %v1704_v24 = vadd.f32 %v5851_v47, %v5844_v44  ;;  %v5259_v42 = vld [vmem:[#allocation5 + $0x3a4] ss:$16 sps:$4 sm:$0xff]   ;;  %v5218_v44 = vld [vmem:[#allocation5 + $0x1a0] ss:$16 sps:$4 sm:$0xff]  }
 0x132   :  { %v1705_v52 = vpop.f32.mrf.mxu1  ;;  %3690 = vmatprep.subr.bf16.mxu1 %v5211_v43  ;;  %v1666_v57 = vpop.f32.mrf.mxu0  ;;  %v5257_v47 = vld [vmem:[#allocation5 + $0x3a0] ss:$16 sps:$4 sm:$0xff]  }
 0x133   :  { %v1706_v56 = vadd.f32 %v1705_v52, %v1664_v49  ;;  %3650 = vmatpush1.bf16.msra.mxu0 %v5182_v48  ;;  %v1956_v30 = vpack.c.bf16 %v1704_v24, %v1704_v24  ;;  %v5262_v48 = vld [vmem:[#allocation5 + $0x384] ss:$16 sps:$4 sm:$0xff]   ;;  %v5224_v49 = vld [vmem:[#allocation5 + $0x180] ss:$16 sps:$4 sm:$0xff]  }
 0x134   :  { %v1707_v60 = vpop.f32.mrf.mxu1  ;;  %v1667_v63 = vpop.f32.mrf.mxu0  ;;  %3651 = vmatprep.subr.bf16.mxu0 %v5187_v50  ;;  %v5232_v50 = vld [vmem:[#allocation5 + $0x164] ss:$16 sps:$4 sm:$0xff]  }
 0x135   :  { %v1957_v62 = vpack.c.bf16 %v1706_v56, %v1706_v56  ;;  %3691 = vmatpush1.bf16.msra.mxu1 %v5209_v51  ;;  %v2071_v37 = vadd.bf16 %v2021_v31, %v1956_v30  ;;  %v5260_v51 = vld [vmem:[#allocation5 + $0x380] ss:$16 sps:$4 sm:$0xff]   ;;  %v5265_v52 = vld [vmem:[#allocation5 + $0x364] ss:$16 sps:$4 sm:$0xff]  }
 0x136   :  { %v1708_v58 = vpop.f32.mrf.mxu1  ;;  %3692 = vmatprep.subr.bf16.mxu1 %v5217_v55  ;;  %v5230_v55 = vld [vmem:[#allocation5 + $0x160] ss:$16 sps:$4 sm:$0xff]   ;;  %v5238_v56 = vld [vmem:[#allocation5 + $0x144] ss:$16 sps:$4 sm:$0xff]  }
 0x137   :  { %v2072_v1 = vadd.bf16 %v2028_v16, %v1957_v62  ;;  %3652 = vmatpush1.bf16.msra.mxu0 %v5185_v61  ;;  %v2079_v43 = vmul.bf16 1056980736, %v2071_v37  ;;  %v5263_v16 = vld [vmem:[#allocation5 + $0x360] ss:$16 sps:$4 sm:$0xff]   ;;  %v5268_v57 = vld [vmem:[#allocation5 + $0x344] ss:$16 sps:$4 sm:$0xff]  }
 0x138   :  { %3653 = vmatprep.subr.bf16.mxu0 %v5190_v19  ;;  %v5236_v60 = vld [vmem:[#allocation5 + $0x140] ss:$16 sps:$4 sm:$0xff]   ;;  %v5244_v61 = vld [vmem:[#allocation5 + $0x124] ss:$16 sps:$4 sm:$0xff]  }
 0x139   :  { %v2080_v3 = vmul.bf16 1056980736, %v2072_v1  ;;  %3693 = vmatpush1.bf16.msra.mxu1 %v5215_v0  ;;  %v5266_v62 = vld [vmem:[#allocation5 + $0x340] ss:$16 sps:$4 sm:$0xff]   ;;  %v5271_v63 = vld [vmem:[#allocation5 + $0x324] ss:$16 sps:$4 sm:$0xff]  }
 0x13a   :  { %3694 = vmatprep.subr.bf16.mxu1 %v5223_v59  ;;  %v5242_v19 = vld [vmem:[#allocation5 + $0x120] ss:$16 sps:$4 sm:$0xff]   ;;  %v5250_v0 = vld [vmem:[#allocation5 + $0x104] ss:$16 sps:$4 sm:$0xff]  }
 0x13b   :  { %5604 = vtanh.bf16 %v2080_v3  ;;  %3654 = vmatpush1.bf16.msra.mxu0 %v5188_v2  ;;  %v5269_v58 = vld [vmem:[#allocation5 + $0x320] ss:$16 sps:$4 sm:$0xff]   ;;  %v5274_v1 = vld [vmem:[#allocation5 + $0x304] ss:$16 sps:$4 sm:$0xff]  }
 0x13c   :  { %3655 = vmatprep.subr.bf16.mxu0 %v5193_v4  ;;  %5606 = vtanh.bf16 %v2079_v43  ;;  %v5248_v2 = vld [vmem:[#allocation5 + $0x100] ss:$16 sps:$4 sm:$0xff]   ;;  %v2011_v4 = vcombine.high %v5857_v15, %v5857_v15 }
 0x13d   :  { %3695 = vmatpush1.bf16.msra.mxu1 %v5221_v5  ;;  %v5272_v5 = vld [vmem:[#allocation5 + $0x300] ss:$16 sps:$4 sm:$0xff]  }
 0x13e   :  { %3696 = vmatprep.subr.bf16.mxu1 %v5229_v6  ;;  %v5277_v6 = vld [vmem:[#allocation5 + $0x4e4] ss:$16 sps:$4 sm:$0xff]   ;;  %v5284_v37 = vld [vmem:[#allocation5 + $0x480] ss:$16 sps:$4 sm:$0xff]  }
 0x13f   :  { %3656 = vmatpush1.bf16.msra.mxu0 %v5191_v7  ;;  %v5326_v7 = vld [vmem:[#allocation5 + $0x6e4] ss:$16 sps:$4 sm:$0xff]   ;;  %v5290_v43 = vld [vmem:[#allocation5 + $0x440] ss:$16 sps:$4 sm:$0xff]  }
 0x140   :  { %3657 = vmatprep.subr.bf16.mxu0 %v5196_v8  ;;  %v2013_v8 = vcombine.high %v5842_v39, %v5842_v39 }
 0x141   :  { %3697 = vmatpush1.bf16.msra.mxu1 %v5227_v9  ;;  %v5275_v9 = vld [vmem:[#allocation5 + $0x4e0] ss:$16 sps:$4 sm:$0xff]  }
 0x142   :  { %3698 = vmatprep.subr.bf16.mxu1 %v5235_v10  ;;  %v2030_v10 = vpack.i.b16 %v2011_v4, %v2011_v4  ;;  %v5309_v4 = vld [vmem:[#allocation5 + $0x580] ss:$16 sps:$4 sm:$0xff]  }
 0x143   :  { %3658 = vmatpush1.bf16.msra.mxu0 %v5194_v11 }
 0x144   :  { %3659 = vmatprep.subr.bf16.mxu0 %v5199_v12  ;;  %v5280_v12 = vld [vmem:[#allocation5 + $0x4c4] ss:$16 sps:$4 sm:$0xff]  }
 0x145   :  { %3699 = vmatpush1.bf16.msra.mxu1 %v5233_v13 }
 0x146   :  { %3700 = vmatprep.subr.bf16.mxu1 %v5241_v14  ;;  %v2037_v14 = vpack.i.b16 %v2013_v8, %v2013_v8  ;;  %v5312_v8 = vld [vmem:[#allocation5 + $0x560] ss:$16 sps:$4 sm:$0xff]  }
 0x147   :  { %3660 = vmatpush1.bf16.msra.mxu0 %v5197_v17  ;;  %v5278_v17 = vld [vmem:[#allocation5 + $0x4c0] ss:$16 sps:$4 sm:$0xff]  }
 0x148   :  { %3661 = vmatprep.subr.bf16.mxu0 %v5202_v18 }
 0x149   :  { %v5605_v27 = vpop.eup %5604  ;;  %3701 = vmatpush1.bf16.msra.mxu1 %v5239_v20  ;;  %v2035_v20 = vrot.slane %v2030_v10, %v5846_v45  ;;  %v5317_v10 = vld [vmem:[#allocation5 + $0x544] ss:$16 sps:$4 sm:$0xff]  }
 0x14a   :  { %v2096_v28 = vmul.bf16 1056980736, %v5605_v27  ;;  %3702 = vmatprep.subr.bf16.mxu1 %v5247_v22  ;;  %v5607_v59 = vpop.eup %5606  ;;  %v5283_v22 = vld [vmem:[#allocation5 + $0x4a4] ss:$16 sps:$4 sm:$0xff]   ;;  %v2042_v27 = vrot.slane %v2037_v14, %v5846_v45  ;;  %v5315_v14 = vld [vmem:[#allocation5 + $0x540] ss:$16 sps:$4 sm:$0xff]  }
 0x14b   :  { %3662 = vmatpush1.bf16.msra.mxu0 %v5200_v26  ;;  %v2095_v3 = vmul.bf16 1056980736, %v5607_v59  ;;  %v5306_v59 = vld [vmem:[#allocation5 + $0x5a0] ss:$16 sps:$4 sm:$0xff]  }
 0x14c   :  { %v5864_v32 = vadd.bf16 1056980736, %v2096_v28  ;;  %3663 = vmatprep.subr.bf16.mxu0 %v5208_v53  ;;  %v5281_v28 = vld [vmem:[#allocation5 + $0x4a0] ss:$16 sps:$4 sm:$0xff]  }
 0x14d   :  { %3703 = vmatpush1.bf16.msra.mxu1 %v5245_v54  ;;  %v5871_v11 = vadd.bf16 1056980736, %v2095_v3  ;;  %v5344_v3 = vld [vmem:[#allocation5 + $0x684] ss:$16 sps:$4 sm:$0xff]  }
 0x14e   :  { %3679 = vmatprep.mubr.bf16.mxu0 %v5864_v32  ;;  %3704 = vmatprep.subr.bf16.mxu1 %v5253_v29 }
 0x14f   :  { %3664 = vmatpush2.bf16.msra.mxu0 %v5206_v33  ;;  %v5286_v33 = vld [vmem:[#allocation5 + $0x484] ss:$16 sps:$4 sm:$0xff]  }
 0x150   :  { %3665 = vmatprep.subr.bf16.mxu0 %v5214_v34 }
 0x151   :  { %3705 = vmatpush2.bf16.msra.mxu1 %v5251_v35 }
 0x152   :  { %3706 = vmatprep.subr.bf16.mxu1 %v5256_v36 }
 0x153   :  { %3666 = vmatpush2.bf16.msra.mxu0 %v5212_v38 }
 0x154   :  { %3667 = vmatprep.subr.bf16.mxu0 %v5220_v40  ;;  %v5289_v40 = vld [vmem:[#allocation5 + $0x464] ss:$16 sps:$4 sm:$0xff]  }
 0x155   :  { %3707 = vmatpush2.bf16.msra.mxu1 %v5254_v41  ;;  %v5287_v41 = vld [vmem:[#allocation5 + $0x460] ss:$16 sps:$4 sm:$0xff]  }
 0x156   :  { %3708 = vmatprep.subr.bf16.mxu1 %v5259_v42  ;;  %v5292_v42 = vld [vmem:[#allocation5 + $0x444] ss:$16 sps:$4 sm:$0xff]  }
 0x157   :  { %3668 = vmatpush2.bf16.msra.mxu0 %v5218_v44  ;;  %v5295_v44 = vld [vmem:[#allocation5 + $0x424] ss:$16 sps:$4 sm:$0xff]  }
 0x158   :  { %3669 = vmatprep.subr.bf16.mxu0 %v5226_v46  ;;  %v5293_v46 = vld [vmem:[#allocation5 + $0x420] ss:$16 sps:$4 sm:$0xff]  }
 0x159   :  { %3709 = vmatpush2.bf16.msra.mxu1 %v5257_v47  ;;  %v5298_v47 = vld [vmem:[#allocation5 + $0x404] ss:$16 sps:$4 sm:$0xff]  }
 0x15a   :  { %3710 = vmatprep.subr.bf16.mxu1 %v5262_v48 }
 0x15b   :  { %3670 = vmatpush2.bf16.msra.mxu0 %v5224_v49  ;;  %v5296_v49 = vld [vmem:[#allocation5 + $0x400] ss:$16 sps:$4 sm:$0xff]  }
 0x15c   :  { %3671 = vmatprep.subr.bf16.mxu0 %v5232_v50 }
 0x15d   :  { %3711 = vmatpush2.bf16.msra.mxu1 %v5260_v51 }
 0x15e   :  { %3712 = vmatprep.subr.bf16.mxu1 %v5265_v52  ;;  %v5301_v52 = vld [vmem:[#allocation5 + $0x5e4] ss:$16 sps:$4 sm:$0xff]  }
 0x15f   :  { %3672 = vmatpush2.bf16.msra.mxu0 %v5230_v55 }
 0x160   :  { %3673 = vmatprep.subr.bf16.mxu0 %v5238_v56 }
 0x161   :  { %3713 = vmatpush2.bf16.msra.mxu1 %v5263_v16  ;;  %v5299_v16 = vld [vmem:[#allocation5 + $0x5e0] ss:$16 sps:$4 sm:$0xff]  }
 0x162   :  { %3714 = vmatprep.subr.bf16.mxu1 %v5268_v57  ;;  %v5324_v57 = vld [vmem:[#allocation5 + $0x6e0] ss:$16 sps:$4 sm:$0xff]  }
 0x163   :  { %3674 = vmatpush2.bf16.msra.mxu0 %v5236_v60 }
 0x164   :  { %3675 = vmatprep.subr.bf16.mxu0 %v5244_v61  ;;  %v5305_v61 = vld [vmem:[#allocation5 + $0x5c4] ss:$16 sps:$4 sm:$0xff]  }
 0x165   :  { %3715 = vmatpush2.bf16.msra.mxu1 %v5266_v62  ;;  %v5332_v62 = vld [vmem:[#allocation5 + $0x6c4] ss:$16 sps:$4 sm:$0xff]  }
 0x166   :  { %3716 = vmatprep.subr.bf16.mxu1 %v5271_v63  ;;  %v5303_v63 = vld [vmem:[#allocation5 + $0x5c0] ss:$16 sps:$4 sm:$0xff]  }
 0x167   :  { %3676 = vmatpush2.bf16.msra.mxu0 %v5242_v19  ;;  %v5330_v19 = vld [vmem:[#allocation5 + $0x6c0] ss:$16 sps:$4 sm:$0xff]  }
 0x168   :  { %3677 = vmatprep.subr.bf16.mxu0 %v5250_v0  ;;  %v5308_v0 = vld [vmem:[#allocation5 + $0x5a4] ss:$16 sps:$4 sm:$0xff]  }
 0x169   :  { %3717 = vmatpush2.bf16.msra.mxu1 %v5269_v58  ;;  %v5338_v58 = vld [vmem:[#allocation5 + $0x6a4] ss:$16 sps:$4 sm:$0xff]  }
 0x16a   :  { %3718 = vmatprep.subr.bf16.mxu1 %v5274_v1  ;;  %v5336_v1 = vld [vmem:[#allocation5 + $0x6a0] ss:$16 sps:$4 sm:$0xff]  }
 0x16b   :  { %3678 = vmatpush2.bf16.msra.mxu0 %v5248_v2  ;;  %v5311_v2 = vld [vmem:[#allocation5 + $0x584] ss:$16 sps:$4 sm:$0xff]  }
 0x16c   :  { %3729 = vmatprep.subr.bf16.mxu0 %v5277_v6  ;;  %v5314_v6 = vld [vmem:[#allocation5 + $0x564] ss:$16 sps:$4 sm:$0xff]  }
 0x16d   :  { %3719 = vmatpush2.bf16.msra.mxu1 %v5272_v5  ;;  %v5342_v5 = vld [vmem:[#allocation5 + $0x680] ss:$16 sps:$4 sm:$0xff]  }
 0x16e   :  { %3770 = vmatprep.subr.bf16.mxu1 %v5326_v7  ;;  %v1744_v13 = vpop.f32.mrf.mxu0  ;;  %3680 = vmatmul.mubr.bf16.vlgmr.msra.gmra.mxu0 %v5871_v11  ;;  %v5350_v7 = vld [vmem:[#allocation5 + $0x664] ss:$16 sps:$4 sm:$0xff]  }
 0x16f   :  { %3730 = vmatpush1.bf16.msra.mxu0 %v5275_v9  ;;  %v5348_v9 = vld [vmem:[#allocation5 + $0x660] ss:$16 sps:$4 sm:$0xff]  }
 0x170   :  { %v1785_v15 = vpop.f32.mrf.mxu1  ;;  %v1746_v39 = vpop.f32.mrf.mxu0  ;;  %3731 = vmatprep.subr.bf16.mxu0 %v5280_v12  ;;  %v5356_v12 = vld [vmem:[#allocation5 + $0x644] ss:$16 sps:$4 sm:$0xff]  }
 0x171   :  { %v1786_v18 = vadd.f32 %v1785_v15, %v1744_v13  ;;  %v1966_v13 = vcombine.high %v5833_v23, %v5833_v23  ;;  %v5354_v15 = vld [vmem:[#allocation5 + $0x640] ss:$16 sps:$4 sm:$0xff]  }
 0x172   :  { %v1787_v24 = vpop.f32.mrf.mxu1  ;;  %v1748_v53 = vpop.f32.mrf.mxu0  ;;  %v5321_v23 = vld [vmem:[#allocation5 + $0x500] ss:$16 sps:$4 sm:$0xff]  }
 0x173   :  { %v1958_v25 = vpack.c.bf16 %v1786_v18, %v1786_v18  ;;  %v1788_v26 = vadd.f32 %v1787_v24, %v1746_v39  ;;  %3732 = vmatpush1.bf16.msra.mxu0 %v5278_v17  ;;  %v5320_v17 = vld [vmem:[#allocation5 + $0x524] ss:$16 sps:$4 sm:$0xff]   ;;  %v5318_v39 = vld [vmem:[#allocation5 + $0x520] ss:$16 sps:$4 sm:$0xff]  }
 0x174   :  { %v1789_v54 = vpop.f32.mrf.mxu1  ;;  %v1749_v31 = vpop.f32.mrf.mxu0  ;;  %3733 = vmatprep.subr.bf16.mxu0 %v5283_v22  ;;  %v5362_v18 = vld [vmem:[#allocation5 + $0x624] ss:$16 sps:$4 sm:$0xff]   ;;  %v5360_v22 = vld [vmem:[#allocation5 + $0x620] ss:$16 sps:$4 sm:$0xff]  }
 0x175   :  { %v2073_v29 = vadd.bf16 %v2035_v20, %v1958_v25  ;;  %v1959_v30 = vpack.c.bf16 %v1788_v26, %v1788_v26  ;;  %v1980_v20 = vrot.slane %v1966_v13, %v5828_v21  ;;  %v5323_v24 = vld [vmem:[#allocation5 + $0x504] ss:$16 sps:$4 sm:$0xff]   ;;  %v5329_v54 = vld [vmem:[#allocation5 + $0xec] ss:$16 sps:$4 sm:$0xff]   ;;  %v5327_v13 = vld [vmem:[#allocation5 + $0xe8] ss:$16 sps:$4 sm:$0xff]  }
 0x176   :  { %v1790_v34 = vpop.f32.mrf.mxu1  ;;  %v5368_v25 = vld [vmem:[#allocation5 + $0x604] ss:$16 sps:$4 sm:$0xff]  }
 0x177   :  { %v2081_v35 = vmul.bf16 1056980736, %v2073_v29  ;;  %v2074_v36 = vadd.bf16 %v2042_v27, %v1959_v30  ;;  %3734 = vmatpush1.bf16.msra.mxu0 %v5281_v28  ;;  %v1982_v26 = vcombine.high %v1980_v20, %v1980_v20  ;;  %v5366_v27 = vld [vmem:[#allocation5 + $0x600] ss:$16 sps:$4 sm:$0xff]   ;;  %v5886_v53 = vrot.slane %v1980_v20, %v5828_v21  ;;  %v5374_v28 = vld [vmem:[#allocation5 + $0x7e4] ss:$16 sps:$4 sm:$0xff]  }
 0x178   :  { %3735 = vmatprep.subr.bf16.mxu0 %v5286_v33  ;;  %v5372_v30 = vld [vmem:[#allocation5 + $0x7e0] ss:$16 sps:$4 sm:$0xff]   ;;  %v5380_v33 = vld [vmem:[#allocation5 + $0x7c4] ss:$16 sps:$4 sm:$0xff]   ;;  %v5339_v20 = vld [vmem:[#allocation5 + $0xa8] ss:$16 sps:$4 sm:$0xff]  }
 0x179   :  { %5608 = vtanh.bf16 %v2081_v35  ;;  %v2082_v38 = vmul.bf16 1056980736, %v2074_v36  ;;  %v5889_v29 = vrot.slane %v1982_v26, %v5828_v21  ;;  %v2044_v31 = vpack.i.b16 %v5886_v53, %v5886_v53  ;;  %v5359_v26 = vld [vmem:[#allocation5 + $0x4c] ss:$16 sps:$4 sm:$0xff]  }
 0x17b   :  { %5610 = vtanh.bf16 %v2082_v38  ;;  %3736 = vmatpush1.bf16.msra.mxu0 %v5284_v37  ;;  %v2051_v35 = vpack.i.b16 %v5889_v29, %v5889_v29  ;;  %v5378_v37 = vld [vmem:[#allocation5 + $0x7c0] ss:$16 sps:$4 sm:$0xff]  }
 0x17c   :  { %3737 = vmatprep.subr.bf16.mxu0 %v5289_v40  ;;  %v2049_v40 = vrot.slane %v2044_v31, %v5846_v45  ;;  %v2012_v31 = vcombine.high %v5886_v53, %v5886_v53 }
 0x17f   :  { %3738 = vmatpush1.bf16.msra.mxu0 %v5287_v41 }
 0x180   :  { %3739 = vmatprep.subr.bf16.mxu0 %v5292_v42  ;;  %v5386_v42 = vld [vmem:[#allocation5 + $0x7a4] ss:$16 sps:$4 sm:$0xff]  }
 0x183   :  { %3740 = vmatpush1.bf16.msra.mxu0 %v5290_v43 }
 0x184   :  { %3741 = vmatprep.subr.bf16.mxu0 %v5295_v44 }
 0x187   :  { %v5609_v48 = vpop.eup %5608  ;;  %3742 = vmatpush1.bf16.msra.mxu0 %v5293_v46 }
 0x188   :  { %v2097_v51 = vmul.bf16 1056980736, %v5609_v48  ;;  %3743 = vmatprep.subr.bf16.mxu0 %v5298_v47  ;;  %v2056_v47 = vrot.slane %v2051_v35, %v5846_v45  ;;  %v2058_v35 = vpack.i.b16 %v2012_v31, %v2012_v31  ;;  %v5444_v31 = vld [vmem:[#allocation5 + $0x268] ss:$16 sps:$4 sm:$0xff]  }
 0x189   :  { %v5611_v50 = vpop.eup %5610 }
 0x18a   :  { %v2098_v55 = vmul.bf16 1056980736, %v5611_v50  ;;  %v5878_v60 = vadd.bf16 1056980736, %v2097_v51  ;;  %v5384_v50 = vld [vmem:[#allocation5 + $0x7a0] ss:$16 sps:$4 sm:$0xff]  }
 0x18b   :  { %3744 = vmatpush1.bf16.msra.mxu0 %v5296_v49 }
 0x18c   :  { %v5876_v56 = vadd.bf16 1056980736, %v2098_v55  ;;  %3745 = vmatprep.subr.bf16.mxu0 %v5301_v52 }
 0x18e   :  { %3720 = vmatprep.mubr.bf16.mxu1 %v5876_v56 }
 0x18f   :  { %3721 = vmatmul.mubr.bf16.vlgmr.msra.gmra.mxu1 %v5878_v60  ;;  %3746 = vmatpush2.bf16.msra.mxu0 %v5299_v16  ;;  %v5392_v16 = vld [vmem:[#allocation5 + $0x784] ss:$16 sps:$4 sm:$0xff]  }
 0x190   :  { %3771 = vmatpush1.bf16.msra.mxu1 %v5324_v57  ;;  %3747 = vmatprep.subr.bf16.mxu0 %v5305_v61 }
 0x191   :  { %3772 = vmatprep.subr.bf16.mxu1 %v5332_v62 }
 0x193   :  { %3748 = vmatpush2.bf16.msra.mxu0 %v5303_v63  ;;  %v5390_v63 = vld [vmem:[#allocation5 + $0x780] ss:$16 sps:$4 sm:$0xff]  }
 0x194   :  { %3773 = vmatpush1.bf16.msra.mxu1 %v5330_v19  ;;  %3749 = vmatprep.subr.bf16.mxu0 %v5308_v0  ;;  %v5398_v0 = vld [vmem:[#allocation5 + $0x764] ss:$16 sps:$4 sm:$0xff]  }
 0x195   :  { %3774 = vmatprep.subr.bf16.mxu1 %v5338_v58  ;;  %v5396_v58 = vld [vmem:[#allocation5 + $0x760] ss:$16 sps:$4 sm:$0xff]  }
 0x197   :  { %3750 = vmatpush2.bf16.msra.mxu0 %v5306_v59  ;;  %v5404_v59 = vld [vmem:[#allocation5 + $0x744] ss:$16 sps:$4 sm:$0xff]  }
 0x198   :  { %3775 = vmatpush1.bf16.msra.mxu1 %v5336_v1  ;;  %3751 = vmatprep.subr.bf16.mxu0 %v5311_v2  ;;  %v5402_v1 = vld [vmem:[#allocation5 + $0x740] ss:$16 sps:$4 sm:$0xff]   ;;  %v5410_v2 = vld [vmem:[#allocation5 + $0x724] ss:$16 sps:$4 sm:$0xff]  }
 0x199   :  { %3776 = vmatprep.subr.bf16.mxu1 %v5344_v3  ;;  %v5408_v3 = vld [vmem:[#allocation5 + $0x720] ss:$16 sps:$4 sm:$0xff]  }
 0x19b   :  { %3752 = vmatpush2.bf16.msra.mxu0 %v5309_v4  ;;  %v5416_v4 = vld [vmem:[#allocation5 + $0x704] ss:$16 sps:$4 sm:$0xff]  }
 0x19c   :  { %3777 = vmatpush1.bf16.msra.mxu1 %v5342_v5  ;;  %3753 = vmatprep.subr.bf16.mxu0 %v5314_v6  ;;  %v5414_v6 = vld [vmem:[#allocation5 + $0x700] ss:$16 sps:$4 sm:$0xff]  }
 0x19d   :  { %3778 = vmatprep.subr.bf16.mxu1 %v5350_v7 }
 0x19f   :  { %3754 = vmatpush2.bf16.msra.mxu0 %v5312_v8 }
 0x1a0   :  { %3779 = vmatpush1.bf16.msra.mxu1 %v5348_v9  ;;  %3755 = vmatprep.subr.bf16.mxu0 %v5317_v10  ;;  %v5422_v9 = vld [vmem:[#allocation5 + $0x2ec] ss:$16 sps:$4 sm:$0xff]  }
 0x1a1   :  { %3780 = vmatprep.subr.bf16.mxu1 %v5356_v12 }
 0x1a3   :  { %3756 = vmatpush2.bf16.msra.mxu0 %v5315_v14 }
 0x1a4   :  { %3781 = vmatpush1.bf16.msra.mxu1 %v5354_v15  ;;  %3757 = vmatprep.subr.bf16.mxu0 %v5320_v17  ;;  %v5335_v15 = vld [vmem:[#allocation5 + $0xcc] ss:$16 sps:$4 sm:$0xff]   ;;  %v5333_v17 = vld [vmem:[#allocation5 + $0xc8] ss:$16 sps:$4 sm:$0xff]  }
 0x1a5   :  { %3782 = vmatprep.subr.bf16.mxu1 %v5362_v18  ;;  %v5341_v18 = vld [vmem:[#allocation5 + $0xac] ss:$16 sps:$4 sm:$0xff]  }
 0x1a7   :  { %3758 = vmatpush2.bf16.msra.mxu0 %v5318_v39  ;;  %v5347_v39 = vld [vmem:[#allocation5 + $0x8c] ss:$16 sps:$4 sm:$0xff]  }
 0x1a8   :  { %3783 = vmatpush1.bf16.msra.mxu1 %v5360_v22  ;;  %3759 = vmatprep.subr.bf16.mxu0 %v5323_v24  ;;  %v5345_v22 = vld [vmem:[#allocation5 + $0x88] ss:$16 sps:$4 sm:$0xff]   ;;  %v5353_v24 = vld [vmem:[#allocation5 + $0x6c] ss:$16 sps:$4 sm:$0xff]  }
 0x1a9   :  { %3784 = vmatprep.subr.bf16.mxu1 %v5368_v25  ;;  %v5351_v25 = vld [vmem:[#allocation5 + $0x68] ss:$16 sps:$4 sm:$0xff]  }
 0x1ab   :  { %3760 = vmatpush2.bf16.msra.mxu0 %v5321_v23  ;;  %v5357_v23 = vld [vmem:[#allocation5 + $0x48] ss:$16 sps:$4 sm:$0xff]  }
 0x1ac   :  { %3785 = vmatpush1.bf16.msra.mxu1 %v5366_v27  ;;  %3811 = vmatprep.subr.bf16.mxu0 %v5329_v54  ;;  %v5365_v27 = vld [vmem:[#allocation5 + $0x2c] ss:$16 sps:$4 sm:$0xff]  }
 0x1ad   :  { %3786 = vmatprep.subr.bf16.mxu1 %v5374_v28  ;;  %v5371_v54 = vld [vmem:[#allocation5 + $0xc] ss:$16 sps:$4 sm:$0xff]   ;;  %v5369_v28 = vld [vmem:[#allocation5 + $0x8] ss:$16 sps:$4 sm:$0xff]  }
 0x1ae   :  { %v1826_v34 = vpop.f32.mrf.mxu0 }
 0x1b0   :  { %v1867_v36 = vpop.f32.mrf.mxu1  ;;  %3787 = vmatpush2.bf16.msra.mxu1 %v5372_v30  ;;  %v1828_v41 = vpop.f32.mrf.mxu0  ;;  %v5377_v30 = vld [vmem:[#allocation5 + $0x1ec] ss:$16 sps:$4 sm:$0xff]  }
 0x1b1   :  { %v1868_v38 = vadd.f32 %v1867_v36, %v1826_v34  ;;  %3788 = vmatprep.subr.bf16.mxu1 %v5380_v33  ;;  %v2014_v33 = vcombine.high %v5889_v29, %v5889_v29  ;;  %v5375_v34 = vld [vmem:[#allocation5 + $0x1e8] ss:$16 sps:$4 sm:$0xff]   ;;  %v5383_v36 = vld [vmem:[#allocation5 + $0x1cc] ss:$16 sps:$4 sm:$0xff]  }
 0x1b2   :  { %v1869_v43 = vpop.f32.mrf.mxu1  ;;  %v1830_v48 = vpop.f32.mrf.mxu0 }
 0x1b3   :  { %v1960_v44 = vpack.c.bf16 %v1868_v38, %v1868_v38  ;;  %v1870_v46 = vadd.f32 %v1869_v43, %v1828_v41  ;;  %v2065_v38 = vpack.i.b16 %v2014_v33, %v2014_v33  ;;  %v5381_v41 = vld [vmem:[#allocation5 + $0x1c8] ss:$16 sps:$4 sm:$0xff]   ;;  %v2063_v43 = vrot.slane %v2058_v35, %v5846_v45  ;;  %v5455_v35 = vld [vmem:[#allocation5 + $0x44c] ss:$16 sps:$4 sm:$0xff]  }
 0x1b4   :  { %v1871_v49 = vpop.f32.mrf.mxu1  ;;  %3789 = vmatpush2.bf16.msra.mxu1 %v5378_v37  ;;  %v1831_v55 = vpop.f32.mrf.mxu0  ;;  %v5447_v33 = vld [vmem:[#allocation5 + $0x468] ss:$16 sps:$4 sm:$0xff]  }
 0x1b5   :  { %v2075_v51 = vadd.bf16 %v2049_v40, %v1960_v44  ;;  %v1961_v52 = vpack.c.bf16 %v1870_v46, %v1870_v46  ;;  %3790 = vmatprep.subr.bf16.mxu1 %v5386_v42  ;;  %v5389_v46 = vld [vmem:[#allocation5 + $0x1ac] ss:$16 sps:$4 sm:$0xff]   ;;  %v2070_v29 = vrot.slane %v2065_v38, %v5846_v45 }
 0x1b6   :  { %v1872_v57 = vpop.f32.mrf.mxu1  ;;  %v5458_v38 = vld [vmem:[#allocation5 + $0x22c] ss:$16 sps:$4 sm:$0xff]  }
 0x1b7   :  { %v2083_v61 = vmul.bf16 1056980736, %v2075_v51  ;;  %v2076_v62 = vadd.bf16 %v2056_v47, %v1961_v52  ;;  %v5387_v51 = vld [vmem:[#allocation5 + $0x1a8] ss:$16 sps:$4 sm:$0xff]   ;;  %v5395_v57 = vld [vmem:[#allocation5 + $0x18c] ss:$16 sps:$4 sm:$0xff]  }
 0x1b8   :  { %3791 = vmatpush2.bf16.msra.mxu1 %v5384_v50 }
 0x1b9   :  { %5612 = vtanh.bf16 %v2083_v61  ;;  %v2084_v19 = vmul.bf16 1056980736, %v2076_v62  ;;  %3792 = vmatprep.subr.bf16.mxu1 %v5392_v16 }
 0x1bb   :  { %5614 = vtanh.bf16 %v2084_v19  ;;  %v5393_v19 = vld [vmem:[#allocation5 + $0x188] ss:$16 sps:$4 sm:$0xff]  }
 0x1bc   :  { %3793 = vmatpush2.bf16.msra.mxu1 %v5390_v63 }
 0x1bd   :  { %3794 = vmatprep.subr.bf16.mxu1 %v5398_v0 }
 0x1c0   :  { %3795 = vmatpush2.bf16.msra.mxu1 %v5396_v58  ;;  %v5401_v58 = vld [vmem:[#allocation5 + $0x16c] ss:$16 sps:$4 sm:$0xff]  }
 0x1c1   :  { %3796 = vmatprep.subr.bf16.mxu1 %v5404_v59  ;;  %v5399_v59 = vld [vmem:[#allocation5 + $0x168] ss:$16 sps:$4 sm:$0xff]  }
 0x1c4   :  { %3797 = vmatpush2.bf16.msra.mxu1 %v5402_v1  ;;  %v5407_v1 = vld [vmem:[#allocation5 + $0x14c] ss:$16 sps:$4 sm:$0xff]  }
 0x1c5   :  { %3798 = vmatprep.subr.bf16.mxu1 %v5410_v2  ;;  %v5405_v2 = vld [vmem:[#allocation5 + $0x148] ss:$16 sps:$4 sm:$0xff]  }
 0x1c7   :  { %v5613_v5 = vpop.eup %5612 }
 0x1c8   :  { %3799 = vmatpush2.bf16.msra.mxu1 %v5408_v3  ;;  %v2099_v8 = vmul.bf16 1056980736, %v5613_v5  ;;  %v5413_v3 = vld [vmem:[#allocation5 + $0x12c] ss:$16 sps:$4 sm:$0xff]  }
 0x1c9   :  { %v5615_v7 = vpop.eup %5614  ;;  %3800 = vmatprep.subr.bf16.mxu1 %v5416_v4  ;;  %v5411_v4 = vld [vmem:[#allocation5 + $0x128] ss:$16 sps:$4 sm:$0xff]   ;;  %v5419_v5 = vld [vmem:[#allocation5 + $0x10c] ss:$16 sps:$4 sm:$0xff]  }
 0x1ca   :  { %v2100_v10 = vmul.bf16 1056980736, %v5615_v7  ;;  %v5899_v14 = vadd.bf16 1056980736, %v2099_v8  ;;  %v5417_v7 = vld [vmem:[#allocation5 + $0x108] ss:$16 sps:$4 sm:$0xff]  }
 0x1cc   :  { %v5897_v12 = vadd.bf16 1056980736, %v2100_v10  ;;  %3801 = vmatpush2.bf16.msra.mxu1 %v5414_v6  ;;  %v5425_v10 = vld [vmem:[#allocation5 + $0x4ec] ss:$16 sps:$4 sm:$0xff]  }
 0x1cd   :  { %3852 = vmatprep.subr.bf16.mxu1 %v5422_v9 }
 0x1ce   :  { %3761 = vmatprep.mubr.bf16.mxu0 %v5897_v12 }
 0x1cf   :  { %3762 = vmatmul.mubr.bf16.vlgmr.msra.gmra.mxu0 %v5899_v14 }
 0x1d0   :  { %3812 = vmatpush1.bf16.msra.mxu0 %v5327_v13  ;;  %3843 = vmatprep.mubr.bf16.mxu0 %v5864_v32  ;;  %v5363_v32 = vld [vmem:[#allocation5 + $0x28] ss:$16 sps:$4 sm:$0xff]  }
 0x1d1   :  { %3813 = vmatprep.subr.bf16.mxu0 %v5335_v15 }
 0x1d4   :  { %3814 = vmatpush1.bf16.msra.mxu0 %v5333_v17  ;;  %v5420_v17 = vld [vmem:[#allocation5 + $0x2e8] ss:$16 sps:$4 sm:$0xff]  }
 0x1d5   :  { %3815 = vmatprep.subr.bf16.mxu0 %v5341_v18  ;;  %v5423_v18 = vld [vmem:[#allocation5 + $0x4e8] ss:$16 sps:$4 sm:$0xff]  }
 0x1d8   :  { %3816 = vmatpush1.bf16.msra.mxu0 %v5339_v20 }
 0x1d9   :  { %3817 = vmatprep.subr.bf16.mxu0 %v5347_v39  ;;  %v5428_v39 = vld [vmem:[#allocation5 + $0x2cc] ss:$16 sps:$4 sm:$0xff]  }
 0x1dc   :  { %3818 = vmatpush1.bf16.msra.mxu0 %v5345_v22  ;;  %v5431_v22 = vld [vmem:[#allocation5 + $0x4cc] ss:$16 sps:$4 sm:$0xff]  }
 0x1dd   :  { %3819 = vmatprep.subr.bf16.mxu0 %v5353_v24  ;;  %v5426_v24 = vld [vmem:[#allocation5 + $0x2c8] ss:$16 sps:$4 sm:$0xff]  }
 0x1e0   :  { %3820 = vmatpush1.bf16.msra.mxu0 %v5351_v25  ;;  %v5429_v25 = vld [vmem:[#allocation5 + $0x4c8] ss:$16 sps:$4 sm:$0xff]  }
 0x1e1   :  { %3821 = vmatprep.subr.bf16.mxu0 %v5359_v26  ;;  %v5434_v26 = vld [vmem:[#allocation5 + $0x2ac] ss:$16 sps:$4 sm:$0xff]  }
 0x1e4   :  { %3822 = vmatpush1.bf16.msra.mxu0 %v5357_v23  ;;  %v5437_v23 = vld [vmem:[#allocation5 + $0x4ac] ss:$16 sps:$4 sm:$0xff]  }
 0x1e5   :  { %3823 = vmatprep.subr.bf16.mxu0 %v5365_v27  ;;  %v5432_v27 = vld [vmem:[#allocation5 + $0x2a8] ss:$16 sps:$4 sm:$0xff]  }
 0x1e8   :  { %3824 = vmatpush1.bf16.msra.mxu0 %v5363_v32  ;;  %v5435_v32 = vld [vmem:[#allocation5 + $0x4a8] ss:$16 sps:$4 sm:$0xff]  }
 0x1e9   :  { %3825 = vmatprep.subr.bf16.mxu0 %v5371_v54  ;;  %v5443_v54 = vld [vmem:[#allocation5 + $0x48c] ss:$16 sps:$4 sm:$0xff]  }
 0x1ec   :  { %3826 = vmatpush1.bf16.msra.mxu0 %v5369_v28  ;;  %v5438_v28 = vld [vmem:[#allocation5 + $0x288] ss:$16 sps:$4 sm:$0xff]  }
 0x1ed   :  { %3827 = vmatprep.subr.bf16.mxu0 %v5377_v30  ;;  %v5441_v30 = vld [vmem:[#allocation5 + $0x488] ss:$16 sps:$4 sm:$0xff]  }
 0x1ee   :  { %v1908_v37 = vpop.f32.mrf.mxu0 }
 0x1f0   :  { %3828 = vmatpush2.bf16.msra.mxu0 %v5375_v34  ;;  %v1949_v40 = vpop.f32.mrf.mxu1  ;;  %v1910_v44 = vpop.f32.mrf.mxu0  ;;  %v5452_v34 = vld [vmem:[#allocation5 + $0x24c] ss:$16 sps:$4 sm:$0xff]  }
 0x1f1   :  { %v1950_v42 = vadd.f32 %v1949_v40, %v1908_v37  ;;  %3829 = vmatprep.subr.bf16.mxu0 %v5383_v36  ;;  %v5450_v36 = vld [vmem:[#allocation5 + $0x248] ss:$16 sps:$4 sm:$0xff]   ;;  %v5461_v40 = vld [vmem:[#allocation5 + $0x42c] ss:$16 sps:$4 sm:$0xff]  }
 0x1f2   :  { %v1951_v53 = vpop.f32.mrf.mxu1  ;;  %v1912_v49 = vpop.f32.mrf.mxu0  ;;  %v5453_v37 = vld [vmem:[#allocation5 + $0x448] ss:$16 sps:$4 sm:$0xff]  }
 0x1f3   :  { %v1962_v47 = vpack.c.bf16 %v1950_v42, %v1950_v42  ;;  %v1952_v48 = vadd.f32 %v1951_v53, %v1910_v44  ;;  %v5459_v42 = vld [vmem:[#allocation5 + $0x428] ss:$16 sps:$4 sm:$0xff]   ;;  %v5467_v44 = vld [vmem:[#allocation5 + $0x40c] ss:$16 sps:$4 sm:$0xff]  }
 0x1f4   :  { %3830 = vmatpush2.bf16.msra.mxu0 %v5381_v41  ;;  %v1953_v50 = vpop.f32.mrf.mxu1  ;;  %v1913_v16 = vpop.f32.mrf.mxu0  ;;  %v5456_v41 = vld [vmem:[#allocation5 + $0x228] ss:$16 sps:$4 sm:$0xff]  }
 0x1f5   :  { %v2077_v52 = vadd.bf16 %v2063_v43, %v1962_v47  ;;  %v1963_v55 = vpack.c.bf16 %v1952_v48, %v1952_v48  ;;  %3831 = vmatprep.subr.bf16.mxu0 %v5389_v46  ;;  %v5464_v43 = vld [vmem:[#allocation5 + $0x20c] ss:$16 sps:$4 sm:$0xff]   ;;  %v5462_v46 = vld [vmem:[#allocation5 + $0x208] ss:$16 sps:$4 sm:$0xff]  }
 0x1f6   :  { %v1954_v61 = vpop.f32.mrf.mxu1  ;;  %v5465_v53 = vld [vmem:[#allocation5 + $0x408] ss:$16 sps:$4 sm:$0xff]   ;;  %v5470_v47 = vld [vmem:[#allocation5 + $0x3ec] ss:$16 sps:$4 sm:$0xff]  }
 0x1f7   :  { %v2085_v62 = vmul.bf16 1056980736, %v2077_v52  ;;  %v2078_v63 = vadd.bf16 %v2070_v29, %v1963_v55  ;;  %v5473_v48 = vld [vmem:[#allocation5 + $0x5ec] ss:$16 sps:$4 sm:$0xff]   ;;  %v5468_v29 = vld [vmem:[#allocation5 + $0x3e8] ss:$16 sps:$4 sm:$0xff]  }
 0x1f8   :  { %3832 = vmatpush2.bf16.msra.mxu0 %v5387_v51  ;;  %v5471_v49 = vld [vmem:[#allocation5 + $0x5e8] ss:$16 sps:$4 sm:$0xff]   ;;  %v5476_v50 = vld [vmem:[#allocation5 + $0x3cc] ss:$16 sps:$4 sm:$0xff]  }
 0x1f9   :  { %5616 = vtanh.bf16 %v2085_v62  ;;  %v2086_v0 = vmul.bf16 1056980736, %v2078_v63  ;;  %3833 = vmatprep.subr.bf16.mxu0 %v5395_v57  ;;  %v5479_v51 = vld [vmem:[#allocation5 + $0x5cc] ss:$16 sps:$4 sm:$0xff]   ;;  %v5474_v55 = vld [vmem:[#allocation5 + $0x3c8] ss:$16 sps:$4 sm:$0xff]  }
 0x1fa   :  { %v5477_v16 = vld [vmem:[#allocation5 + $0x5c8] ss:$16 sps:$4 sm:$0xff]   ;;  %v5482_v61 = vld [vmem:[#allocation5 + $0x3ac] ss:$16 sps:$4 sm:$0xff]  }
 0x1fb   :  { %5618 = vtanh.bf16 %v2086_v0  ;;  %v5485_v62 = vld [vmem:[#allocation5 + $0x5ac] ss:$16 sps:$4 sm:$0xff]   ;;  %v5483_v0 = vld [vmem:[#allocation5 + $0x5a8] ss:$16 sps:$4 sm:$0xff]  }
 0x1fc   :  { %3834 = vmatpush2.bf16.msra.mxu0 %v5393_v19  ;;  %v5480_v19 = vld [vmem:[#allocation5 + $0x3a8] ss:$16 sps:$4 sm:$0xff]  }
 0x1fd   :  { %3835 = vmatprep.subr.bf16.mxu0 %v5401_v58 }
 0x200   :  { %3836 = vmatpush2.bf16.msra.mxu0 %v5399_v59  ;;  %v5488_v59 = vld [vmem:[#allocation5 + $0x38c] ss:$16 sps:$4 sm:$0xff]  }
 0x201   :  { %3837 = vmatprep.subr.bf16.mxu0 %v5407_v1  ;;  %v5491_v1 = vld [vmem:[#allocation5 + $0x58c] ss:$16 sps:$4 sm:$0xff]  }
 0x204   :  { %3838 = vmatpush2.bf16.msra.mxu0 %v5405_v2  ;;  %v5486_v2 = vld [vmem:[#allocation5 + $0x388] ss:$16 sps:$4 sm:$0xff]  }
 0x205   :  { %3839 = vmatprep.subr.bf16.mxu0 %v5413_v3  ;;  %v5489_v3 = vld [vmem:[#allocation5 + $0x588] ss:$16 sps:$4 sm:$0xff]  }
 0x207   :  { %v5617_v6 = vpop.eup %5616 }
 0x208   :  { %3840 = vmatpush2.bf16.msra.mxu0 %v5411_v4  ;;  %v2101_v9 = vmul.bf16 1056980736, %v5617_v6  ;;  %v5494_v4 = vld [vmem:[#allocation5 + $0x36c] ss:$16 sps:$4 sm:$0xff]   ;;  %v5492_v6 = vld [vmem:[#allocation5 + $0x368] ss:$16 sps:$4 sm:$0xff]  }
 0x209   :  { %v5619_v8 = vpop.eup %5618  ;;  %3841 = vmatprep.subr.bf16.mxu0 %v5419_v5  ;;  %v5497_v5 = vld [vmem:[#allocation5 + $0x56c] ss:$16 sps:$4 sm:$0xff]  }
 0x20a   :  { %v2102_v13 = vmul.bf16 1056980736, %v5619_v8  ;;  %v5912_v20 = vadd.bf16 1056980736, %v2101_v9  ;;  %v5500_v8 = vld [vmem:[#allocation5 + $0x34c] ss:$16 sps:$4 sm:$0xff]  }
 0x20b   :  { %v5503_v9 = vld [vmem:[#allocation5 + $0x54c] ss:$16 sps:$4 sm:$0xff]  }
 0x20c   :  { %3842 = vmatpush2.bf16.msra.mxu0 %v5417_v7  ;;  %v5910_v15 = vadd.bf16 1056980736, %v2102_v13  ;;  %v5495_v7 = vld [vmem:[#allocation5 + $0x568] ss:$16 sps:$4 sm:$0xff]  }
 0x20d   :  { %3893 = vmatprep.subr.bf16.mxu0 %v5425_v10  ;;  %v5498_v10 = vld [vmem:[#allocation5 + $0x348] ss:$16 sps:$4 sm:$0xff]  }
 0x20e   :  { %3802 = vmatprep.mubr.bf16.mxu1 %v5910_v15  ;;  %v5501_v13 = vld [vmem:[#allocation5 + $0x548] ss:$16 sps:$4 sm:$0xff]  }
 0x20f   :  { %3844 = vmatmul.mubr.bf16.vlgmr.msra.gmra.mxu0 %v5871_v11  ;;  %3803 = vmatmul.mubr.bf16.vlgmr.msra.gmra.mxu1 %v5912_v20  ;;  %v5440_v11 = vld [vmem:[#allocation5 + $0x28c] ss:$16 sps:$4 sm:$0xff]  }
 0x210   :  { %3853 = vmatpush1.bf16.msra.mxu1 %v5420_v17  ;;  %3894 = vmatpush1.bf16.msra.mxu0 %v5423_v18  ;;  %v5506_v17 = vld [vmem:[#allocation5 + $0x32c] ss:$16 sps:$4 sm:$0xff]  }
 0x211   :  { %3925 = vmatprep.mubr.bf16.mxu0 %v5897_v12  ;;  %3884 = vmatprep.mubr.bf16.mxu1 %v5876_v56  ;;  %v5446_v12 = vld [vmem:[#allocation5 + $0x26c] ss:$16 sps:$4 sm:$0xff]  }
 0x212   :  { %3854 = vmatprep.subr.bf16.mxu1 %v5428_v39  ;;  %3895 = vmatprep.subr.bf16.mxu0 %v5431_v22  ;;  %v5449_v56 = vld [vmem:[#allocation5 + $0x46c] ss:$16 sps:$4 sm:$0xff]   ;;  %v5504_v39 = vld [vmem:[#allocation5 + $0x328] ss:$16 sps:$4 sm:$0xff]  }
 0x213   :  { %v5509_v18 = vld [vmem:[#allocation5 + $0x52c] ss:$16 sps:$4 sm:$0xff]   ;;  %v5507_v22 = vld [vmem:[#allocation5 + $0x528] ss:$16 sps:$4 sm:$0xff]  }
 0x214   :  { %3855 = vmatpush1.bf16.msra.mxu1 %v5426_v24  ;;  %3896 = vmatpush1.bf16.msra.mxu0 %v5429_v25  ;;  %v5512_v24 = vld [vmem:[#allocation5 + $0x30c] ss:$16 sps:$4 sm:$0xff]  }
 0x215   :  { %3856 = vmatprep.subr.bf16.mxu1 %v5434_v26  ;;  %3897 = vmatprep.subr.bf16.mxu0 %v5437_v23  ;;  %v5515_v25 = vld [vmem:[#allocation5 + $0x50c] ss:$16 sps:$4 sm:$0xff]   ;;  %v5510_v26 = vld [vmem:[#allocation5 + $0x308] ss:$16 sps:$4 sm:$0xff]  }
 0x216   :  { %v5513_v23 = vld [vmem:[#allocation5 + $0x508] ss:$16 sps:$4 sm:$0xff]  }
 0x218   :  { %3857 = vmatpush1.bf16.msra.mxu1 %v5432_v27  ;;  %3898 = vmatpush1.bf16.msra.mxu0 %v5435_v32  ;;  %v5518_v27 = vld [vmem:[#allocation5 + $0x6ec] ss:$16 sps:$4 sm:$0xff]   ;;  %v5516_v32 = vld [vmem:[#allocation5 + $0x6e8] ss:$16 sps:$4 sm:$0xff]  }
 0x219   :  { %3858 = vmatprep.subr.bf16.mxu1 %v5440_v11  ;;  %3899 = vmatprep.subr.bf16.mxu0 %v5443_v54  ;;  %v5521_v11 = vld [vmem:[#allocation5 + $0x6cc] ss:$16 sps:$4 sm:$0xff]  }
 0x21a   :  { %v5564_v54 = vld [vmem:[#allocation7 + $0x78] sm:$0xff]  }
 0x21c   :  { %3859 = vmatpush1.bf16.msra.mxu1 %v5438_v28  ;;  %3900 = vmatpush1.bf16.msra.mxu0 %v5441_v30  ;;  %v5565_v30 = vld [vmem:[#allocation7 + $0x38] sm:$0xff]  }
 0x21d   :  { %3860 = vmatprep.subr.bf16.mxu1 %v5446_v12  ;;  %3901 = vmatprep.subr.bf16.mxu0 %v5449_v56  ;;  %v5519_v56 = vld [vmem:[#allocation5 + $0x6c8] ss:$16 sps:$4 sm:$0xff]  }
 0x220   :  { %3861 = vmatpush1.bf16.msra.mxu1 %v5444_v31  ;;  %3902 = vmatpush1.bf16.msra.mxu0 %v5447_v33  ;;  %v5524_v33 = vld [vmem:[#allocation5 + $0x6ac] ss:$16 sps:$4 sm:$0xff]  }
 0x221   :  { %3862 = vmatprep.subr.bf16.mxu1 %v5452_v34  ;;  %3903 = vmatprep.subr.bf16.mxu0 %v5455_v35 }
 0x224   :  { %3863 = vmatpush1.bf16.msra.mxu1 %v5450_v36  ;;  %3904 = vmatpush1.bf16.msra.mxu0 %v5453_v37  ;;  %v5522_v36 = vld [vmem:[#allocation5 + $0x6a8] ss:$16 sps:$4 sm:$0xff]  }
 0x225   :  { %3864 = vmatprep.subr.bf16.mxu1 %v5458_v38  ;;  %3905 = vmatprep.subr.bf16.mxu0 %v5461_v40  ;;  %v5527_v38 = vld [vmem:[#allocation5 + $0x68c] ss:$16 sps:$4 sm:$0xff]  }
 0x226   :  { %v5569_v40 = vld [vmem:[#allocation7 + $0x28] sm:$0xff]  }
 0x228   :  { %3865 = vmatpush1.bf16.msra.mxu1 %v5456_v41  ;;  %3906 = vmatpush1.bf16.msra.mxu0 %v5459_v42  ;;  %v5525_v41 = vld [vmem:[#allocation5 + $0x688] ss:$16 sps:$4 sm:$0xff]   ;;  %v5530_v42 = vld [vmem:[#allocation5 + $0x66c] ss:$16 sps:$4 sm:$0xff]  }
 0x229   :  { %3866 = vmatprep.subr.bf16.mxu1 %v5464_v43  ;;  %3907 = vmatprep.subr.bf16.mxu0 %v5467_v44  ;;  %v5570_v43 = vld [vmem:[#allocation7 + $0x60] sm:$0xff]  }
 0x22a   :  { %v5571_v44 = vld [vmem:[#allocation7 + $0x20] sm:$0xff]  }
 0x22c   :  { %3867 = vmatpush1.bf16.msra.mxu1 %v5462_v46  ;;  %3908 = vmatpush1.bf16.msra.mxu0 %v5465_v53  ;;  %v5528_v46 = vld [vmem:[#allocation5 + $0x668] ss:$16 sps:$4 sm:$0xff]   ;;  %v5533_v53 = vld [vmem:[#allocation5 + $0x64c] ss:$16 sps:$4 sm:$0xff]  }
 0x22d   :  { %3868 = vmatprep.subr.bf16.mxu1 %v5470_v47  ;;  %3909 = vmatprep.subr.bf16.mxu0 %v5473_v48  ;;  %v5572_v47 = vld [vmem:[#allocation7 + $0x58] sm:$0xff]  }
 0x22e   :  { %v5919_v52 = vpop.f32.mrf.mxu0  ;;  %v5573_v48 = vld [vmem:[#allocation7 + $0x18] sm:$0xff]  }
 0x230   :  { %3869 = vmatpush2.bf16.msra.mxu1 %v5468_v29  ;;  %3910 = vmatpush2.bf16.msra.mxu0 %v5471_v49  ;;  %v5921_v57 = vpop.f32.mrf.mxu0  ;;  %v5531_v29 = vld [vmem:[#allocation5 + $0x648] ss:$16 sps:$4 sm:$0xff]   ;;  %v5536_v49 = vld [vmem:[#allocation5 + $0x62c] ss:$16 sps:$4 sm:$0xff]  }
 0x231   :  { %3870 = vmatprep.subr.bf16.mxu1 %v5476_v50  ;;  %3911 = vmatprep.subr.bf16.mxu0 %v5479_v51  ;;  %v5574_v50 = vld [vmem:[#allocation7 + $0x50] sm:$0xff]  }
 0x232   :  { %v3685_v63 = vpop.f32.mrf.mxu0  ;;  %v5575_v51 = vld [vmem:[#allocation7 + $0x10] sm:$0xff]  }
 0x233   :  { %v5542_v63 = vld [vmem:[#allocation5 + $0x7ec] ss:$16 sps:$4 sm:$0xff]  }
 0x234   :  { %3871 = vmatpush2.bf16.msra.mxu1 %v5474_v55  ;;  %3912 = vmatpush2.bf16.msra.mxu0 %v5477_v16  ;;  %v3686_v58 = vpop.f32.mrf.mxu0  ;;  %v5539_v55 = vld [vmem:[#allocation5 + $0x60c] ss:$16 sps:$4 sm:$0xff]  }
 0x235   :  { %3872 = vmatprep.subr.bf16.mxu1 %v5482_v61  ;;  %3913 = vmatprep.subr.bf16.mxu0 %v5485_v62  ;;  %v5576_v16 = vld [vmem:[#allocation7 + $0x48] sm:$0xff]   ;;  %v5578_v61 = vld [vmem:[#allocation7 + $0x40] sm:$0xff]  }
 0x236   :  { %v5537_v62 = vld [vmem:[#allocation5 + $0x608] ss:$16 sps:$4 sm:$0xff]   ;;  %v5545_v58 = vld [vmem:[#allocation5 + $0x7cc] ss:$16 sps:$4 sm:$0xff]  }
 0x238   :  { %3873 = vmatpush2.bf16.msra.mxu1 %v5480_v19  ;;  %3914 = vmatpush2.bf16.msra.mxu0 %v5483_v0  ;;  %v5579_v19 = vld [vmem:[#allocation7] sm:$0xff]   ;;  %v5540_v0 = vld [vmem:[#allocation5 + $0x7e8] ss:$16 sps:$4 sm:$0xff]  }
 0x239   :  { %3874 = vmatprep.subr.bf16.mxu1 %v5488_v59  ;;  %3915 = vmatprep.subr.bf16.mxu0 %v5491_v1  ;;  %v5543_v59 = vld [vmem:[#allocation5 + $0x7c8] ss:$16 sps:$4 sm:$0xff]   ;;  %v5548_v1 = vld [vmem:[#allocation5 + $0x7ac] ss:$16 sps:$4 sm:$0xff]  }
 0x23c   :  { %3875 = vmatpush2.bf16.msra.mxu1 %v5486_v2  ;;  %3916 = vmatpush2.bf16.msra.mxu0 %v5489_v3  ;;  %v5546_v2 = vld [vmem:[#allocation5 + $0x7a8] ss:$16 sps:$4 sm:$0xff]   ;;  %v5551_v3 = vld [vmem:[#allocation5 + $0x78c] ss:$16 sps:$4 sm:$0xff]  }
 0x23d   :  { %3876 = vmatprep.subr.bf16.mxu1 %v5494_v4  ;;  %3917 = vmatprep.subr.bf16.mxu0 %v5497_v5  ;;  %v5549_v4 = vld [vmem:[#allocation5 + $0x788] ss:$16 sps:$4 sm:$0xff]   ;;  %v5554_v5 = vld [vmem:[#allocation5 + $0x76c] ss:$16 sps:$4 sm:$0xff]  }
 0x240   :  { %3877 = vmatpush2.bf16.msra.mxu1 %v5492_v6  ;;  %3918 = vmatpush2.bf16.msra.mxu0 %v5495_v7  ;;  %v5552_v6 = vld [vmem:[#allocation5 + $0x768] ss:$16 sps:$4 sm:$0xff]   ;;  %v5557_v7 = vld [vmem:[#allocation5 + $0x74c] ss:$16 sps:$4 sm:$0xff]  }
 0x241   :  { %3878 = vmatprep.subr.bf16.mxu1 %v5500_v8  ;;  %3919 = vmatprep.subr.bf16.mxu0 %v5503_v9  ;;  %v5555_v8 = vld [vmem:[#allocation5 + $0x748] ss:$16 sps:$4 sm:$0xff]   ;;  %v5560_v9 = vld [vmem:[#allocation5 + $0x72c] ss:$16 sps:$4 sm:$0xff]  }
 0x244   :  { %3879 = vmatpush2.bf16.msra.mxu1 %v5498_v10  ;;  %3920 = vmatpush2.bf16.msra.mxu0 %v5501_v13  ;;  %v5558_v10 = vld [vmem:[#allocation5 + $0x728] ss:$16 sps:$4 sm:$0xff]   ;;  %v5563_v13 = vld [vmem:[#allocation5 + $0x70c] ss:$16 sps:$4 sm:$0xff]  }
 0x245   :  { %3880 = vmatprep.subr.bf16.mxu1 %v5506_v17  ;;  %3921 = vmatprep.subr.bf16.mxu0 %v5509_v18  ;;  %v5561_v17 = vld [vmem:[#allocation5 + $0x708] ss:$16 sps:$4 sm:$0xff]  }
 0x248   :  { %3881 = vmatpush2.bf16.msra.mxu1 %v5504_v39  ;;  %3922 = vmatpush2.bf16.msra.mxu0 %v5507_v22 }
 0x249   :  { %3882 = vmatprep.subr.bf16.mxu1 %v5512_v24  ;;  %3923 = vmatprep.subr.bf16.mxu0 %v5515_v25 }
 0x24c   :  { %3883 = vmatpush2.bf16.msra.mxu1 %v5510_v26  ;;  %3924 = vmatpush2.bf16.msra.mxu0 %v5513_v23  ;;  %v5580_v26 = vld [vmem:[#allocation7 + $0xf8] sm:$0xff]   ;;  %v5047_v23 = vld.sshfl [vmem:[%s5997_s4] sm:$0x33 pattern:$0x75316420] }
 0x24d   :  { %3934 = vmatprep.subr.bf16.mxu1 %v5518_v27  ;;  %5089 = vmatprep.subr.bf16.mxu0 %v5564_v54  ;;  %v3988_v27 = vcombine.high %v5047_v23, %v5047_v23 }
 0x24f   :  { %3885 = vmatmul.mubr.bf16.vlgmr.msra.gmra.mxu1 %v5878_v60  ;;  %3926 = vmatmul.mubr.bf16.vlgmr.msra.gmra.mxu0 %v5899_v14  ;;  %v3722_v28 = vpop.f32.mrf.mxu1  ;;  %v5566_v60 = vld [vmem:[#allocation7 + $0x70] sm:$0xff]  }
 0x250   :  { %v5926_v12 = vadd.f32 %v3722_v28, %v5919_v52  ;;  %3935 = vmatpush1.bf16.msra.mxu1 %v5516_v32  ;;  %3966 = vmatprep.mubr.bf16.mxu1 %v5910_v15  ;;  %v5567_v14 = vld [vmem:[#allocation7 + $0x30] sm:$0xff]   ;;  %v5568_v15 = vld [vmem:[#allocation7 + $0x68] sm:$0xff]   ;;  %v5938_v32 = vrot.slane %v5047_v23, %v5828_v21  ;;  %v5581_v28 = vld [vmem:[#allocation7 + $0xb8] sm:$0xff]  }
 0x251   :  { %v3724_v31 = vpop.f32.mrf.mxu1  ;;  %3936 = vmatprep.subr.bf16.mxu1 %v5521_v11  ;;  %5090 = vmatpush3.bf16.msra.mxu0 %v5565_v30  ;;  %v5534_v52 = vld [vmem:[#allocation5 + $0x628] ss:$16 sps:$4 sm:$0xff]   ;;  %v5941_v11 = vrot.slane %v3988_v27, %v5828_v21  ;;  %v5582_v21 = vld [vmem:[#allocation7 + $0xf0] sm:$0xff]  }
 0x252   :  { %v5930_v34 = vadd.f32 %v3724_v31, %v5921_v57  ;;  %5091 = vmatprep.subr.bf16.mxu0 %v5566_v60  ;;  %v5577_v57 = vld [vmem:[#allocation7 + $0x8] sm:$0xff]  }
 0x253   :  { %v3726_v35 = vpop.f32.mrf.mxu1  ;;  %v4013_v54 = vpack.i.b16 %v5941_v11, %v5941_v11 }
 0x254   :  { %3937 = vmatpush1.bf16.msra.mxu1 %v5519_v56 }
 0x255   :  { %v3727_v37 = vpop.f32.mrf.mxu1  ;;  %3938 = vmatprep.subr.bf16.mxu1 %v5524_v33  ;;  %5092 = vmatpush3.bf16.msra.mxu0 %v5567_v14 }
 0x256   :  { %5093 = vmatprep.subr.bf16.mxu0 %v5568_v15  ;;  %v4018_v37 = vrot.slane %v4013_v54, %v5846_v45 }
 0x258   :  { %3939 = vmatpush1.bf16.msra.mxu1 %v5522_v36 }
 0x259   :  { %3940 = vmatprep.subr.bf16.mxu1 %v5527_v38  ;;  %5094 = vmatpush3.bf16.msra.mxu0 %v5569_v40  ;;  %v5583_v38 = vld [vmem:[#allocation7 + $0xb0] sm:$0xff]  }
 0x25a   :  { %5095 = vmatprep.subr.bf16.mxu0 %v5570_v43 }
 0x25c   :  { %3941 = vmatpush1.bf16.msra.mxu1 %v5525_v41 }
 0x25d   :  { %3942 = vmatprep.subr.bf16.mxu1 %v5530_v42  ;;  %5096 = vmatpush3.bf16.msra.mxu0 %v5571_v44  ;;  %v5584_v44 = vld [vmem:[#allocation7 + $0xe8] sm:$0xff]  }
 0x25e   :  { %5097 = vmatprep.subr.bf16.mxu0 %v5572_v47  ;;  %v5585_v47 = vld [vmem:[#allocation7 + $0xa8] sm:$0xff]  }
 0x260   :  { %3943 = vmatpush1.bf16.msra.mxu1 %v5528_v46 }
 0x261   :  { %3944 = vmatprep.subr.bf16.mxu1 %v5533_v53  ;;  %5098 = vmatpush3.bf16.msra.mxu0 %v5573_v48 }
 0x262   :  { %5099 = vmatprep.subr.bf16.mxu0 %v5574_v50  ;;  %v5588_v50 = vld [vmem:[#allocation7 + $0xd8] sm:$0xff]  }
 0x264   :  { %3945 = vmatpush1.bf16.msra.mxu1 %v5531_v29  ;;  %v5586_v29 = vld [vmem:[#allocation7 + $0xe0] sm:$0xff]  }
 0x265   :  { %3946 = vmatprep.subr.bf16.mxu1 %v5536_v49  ;;  %5100 = vmatpush3.bf16.msra.mxu0 %v5575_v51  ;;  %v5587_v49 = vld [vmem:[#allocation7 + $0xa0] sm:$0xff]   ;;  %v5589_v51 = vld [vmem:[#allocation7 + $0x98] sm:$0xff]  }
 0x266   :  { %5101 = vmatprep.subr.bf16.mxu0 %v5576_v16  ;;  %v5592_v16 = vld [vmem:[#allocation7 + $0xc8] sm:$0xff]  }
 0x268   :  { %3947 = vmatpush1.bf16.msra.mxu1 %v5534_v52  ;;  %v5590_v52 = vld [vmem:[#allocation7 + $0xd0] sm:$0xff]  }
 0x269   :  { %3948 = vmatprep.subr.bf16.mxu1 %v5539_v55  ;;  %5102 = vmatpush3.bf16.msra.mxu0 %v5577_v57  ;;  %v5591_v55 = vld [vmem:[#allocation7 + $0x90] sm:$0xff]  }
 0x26a   :  { %5103 = vmatprep.subr.bf16.mxu0 %v5578_v61  ;;  %v5593_v61 = vld [vmem:[#allocation7 + $0x88] sm:$0xff]  }
 0x26c   :  { %3949 = vmatpush1.bf16.msra.mxu1 %v5537_v62  ;;  %v5594_v62 = vld [vmem:[#allocation7 + $0xc0] sm:$0xff]  }
 0x26d   :  { %3950 = vmatprep.subr.bf16.mxu1 %v5542_v63  ;;  %5104 = vmatpush3.bf16.msra.mxu0 %v5579_v19 }
 0x270   :  { %3951 = vmatpush2.bf16.msra.mxu1 %v5540_v0  ;;  %v5595_v0 = vld [vmem:[#allocation7 + $0x80] sm:$0xff]  }
 0x271   :  { %3952 = vmatprep.subr.bf16.mxu1 %v5545_v58 }
 0x274   :  { %3953 = vmatpush2.bf16.msra.mxu1 %v5543_v59 }
 0x275   :  { %3954 = vmatprep.subr.bf16.mxu1 %v5548_v1 }
 0x278   :  { %3955 = vmatpush2.bf16.msra.mxu1 %v5546_v2 }
 0x279   :  { %3956 = vmatprep.subr.bf16.mxu1 %v5551_v3 }
 0x27c   :  { %3957 = vmatpush2.bf16.msra.mxu1 %v5549_v4 }
 0x27d   :  { %3958 = vmatprep.subr.bf16.mxu1 %v5554_v5 }
 0x280   :  { %3959 = vmatpush2.bf16.msra.mxu1 %v5552_v6 }
 0x281   :  { %3960 = vmatprep.subr.bf16.mxu1 %v5557_v7 }
 0x284   :  { %3961 = vmatpush2.bf16.msra.mxu1 %v5555_v8 }
 0x285   :  { %3962 = vmatprep.subr.bf16.mxu1 %v5560_v9 }
 0x288   :  { %3963 = vmatpush2.bf16.msra.mxu1 %v5558_v10 }
 0x289   :  { %3964 = vmatprep.subr.bf16.mxu1 %v5563_v13 }
 0x28c   :  { %3965 = vmatpush2.bf16.msra.mxu1 %v5561_v17  ;;  %v4003_v17 = vcombine.high %v5938_v32, %v5938_v32 }
 0x28d   :  { %5111 = vmatprep.subr.bf16.mxu1 %v5580_v26 }
 0x28f   :  { %3967 = vmatmul.mubr.bf16.vlgmr.msra.gmra.mxu1 %v5912_v20  ;;  %v3763_v18 = vpop.f32.mrf.mxu0  ;;  %v4006_v20 = vpack.i.b16 %v5938_v32, %v5938_v32 }
 0x290   :  { %v3764_v39 = vadd.f32 %v3763_v18, %v5926_v12  ;;  %5112 = vmatpush3.bf16.msra.mxu1 %v5581_v28  ;;  %v4004_v18 = vcombine.high %v5941_v11, %v5941_v11 }
 0x291   :  { %v3765_v22 = vpop.f32.mrf.mxu0  ;;  %v4011_v33 = vrot.slane %v4006_v20, %v5846_v45  ;;  %5113 = vmatprep.subr.bf16.mxu1 %v5582_v21 }
 0x292   :  { %v3766_v56 = vadd.f32 %v3765_v22, %v5930_v34  ;;  %v4020_v22 = vpack.i.b16 %v4003_v17, %v4003_v17 }
 0x293   :  { %v3767_v24 = vpop.f32.mrf.mxu0 }
 0x294   :  { %5114 = vmatpush3.bf16.msra.mxu1 %v5583_v38  ;;  %v4027_v24 = vpack.i.b16 %v4004_v18, %v4004_v18  ;;  %v4025_v27 = vrot.slane %v4020_v22, %v5846_v45 }
 0x295   :  { %v3768_v25 = vpop.f32.mrf.mxu0  ;;  %5115 = vmatprep.subr.bf16.mxu1 %v5584_v44  ;;  %v5597_v44 = vld [vmem:[%s6000_s7 + $0x30] sm:$0xff]  }
 0x298   :  { %5116 = vmatpush3.bf16.msra.mxu1 %v5585_v47  ;;  %v5599_v47 = vld [vmem:[%s6000_s7 + $0x20] sm:$0xff]  }
 0x299   :  { %5117 = vmatprep.subr.bf16.mxu1 %v5586_v29  ;;  %v5601_v29 = vld [vmem:[%s6000_s7 + $0x10] sm:$0xff]  }
 0x29c   :  { %5118 = vmatpush3.bf16.msra.mxu1 %v5587_v49  ;;  %v5602_v49 = vld [vmem:[%s6000_s7 + $0x8] sm:$0xff]  }
 0x29d   :  { %5119 = vmatprep.subr.bf16.mxu1 %v5588_v50  ;;  %v5603_v50 = vld [vmem:[%s6000_s7] sm:$0xff]  }
 0x2a0   :  { %5120 = vmatpush3.bf16.msra.mxu1 %v5589_v51  ;;  %v4390_v51 = vld [vmem:[%s5999_s6] sm:$0x1]  ;;  %s5728_s6 = smov [#allocation8]  }
 0x2a1   :  { %5121 = vmatprep.subr.bf16.mxu1 %v5590_v52  ;;  %s4521_s1 = sshll.u32 %s5728_s6, 4  ;;  %s4522_s1 = int_to_ptr.vmem [resolvable:$true] %s4521_s1 }
 0x2a2   :  { %s5690_s5 = scalar_lea.vmem %s4522_s1, 128  ;;  %p5695_p2 = scmp.lt.s32.totalorder %s4522_s1, %s4522_s1 }
 0x2a3   :  { %p5691_p1 = scmp.ne.s32.totalorder %s4522_s1, %s5690_s5  ;;  %p5696_p3 = scmp.lt.s32.totalorder %s5690_s5, %s5690_s5 }
 0x2a4   :  { %5122 = vmatpush3.bf16.msra.mxu1 %v5591_v55  ;;  %v4392_v55 = vpack.i.b16 %v4390_v51, %v4390_v51 }
 0x2a5   :  { %5123 = vmatprep.subr.bf16.mxu1 %v5592_v16  ;;  %p5697_p4 = por %p5696_p3, %p5695_p2 }
 0x2a7   :  { %p5698_p5 = pnand %p5697_p4, %p5691_p1 }
 0x2a8   :  { %5124 = vmatpush3.bf16.msra.mxu1 %v5593_v61 }
 0x2a9   :  { %5125 = vmatprep.subr.bf16.mxu1 %v5594_v62 }
 0x2ac   :  { %5126 = vmatpush3.bf16.msra.mxu1 %v5595_v0 }
 0x2cf   :  { %v3845_v30 = vpop.f32.mrf.mxu0  ;;  %v3804_v12 = vpop.f32.mrf.mxu1 }
 0x2d0   :  { %v3805_v31 = vadd.f32 %v3804_v12, %v3764_v39 }
 0x2d1   :  { %v5949_v60 = vpop.f32.mrf.mxu0  ;;  %v3806_v35 = vpop.f32.mrf.mxu1 }
 0x2d2   :  { %v3975_v14 = vpack.c.bf16 %v3805_v31, %v3805_v31  ;;  %v3807_v36 = vadd.f32 %v3806_v35, %v3766_v56 }
 0x2d3   :  { %v3849_v15 = vpop.f32.mrf.mxu0  ;;  %v3808_v40 = vpop.f32.mrf.mxu1 }
 0x2d4   :  { %v4033_v41 = vadd.bf16 %v4011_v33, %v3975_v14  ;;  %v3976_v42 = vpack.c.bf16 %v3807_v36, %v3807_v36  ;;  %v5596_v40 = vld [vmem:[%s6000_s7 + $0x38] sm:$0xff]  }
 0x2d5   :  { %v3850_v34 = vpop.f32.mrf.mxu0  ;;  %v3809_v43 = vpop.f32.mrf.mxu1 }
 0x2d6   :  { %v4037_v46 = vmul.bf16 1056980736, %v4033_v41  ;;  %v4034_v53 = vadd.bf16 %v4018_v37, %v3976_v42  ;;  %v5726_v41 = vmov 0.0  }
 0x2d7   :  { %5142 = vmatprep.subr.bf16.mxu0 %v5726_v41 }
 0x2d8   :  { %5620 = vtanh.bf16 %v4037_v46  ;;  %v4038_v48 = vmul.bf16 1056980736, %v4034_v53  ;;  %v5598_v53 = vld [vmem:[%s6000_s7 + $0x28] sm:$0xff]  }
 0x2da   :  { %5622 = vtanh.bf16 %v4038_v48  ;;  %v5600_v48 = vld [vmem:[%s6000_s7 + $0x18] sm:$0xff]  }
 0x2e6   :  { %v5621_v57 = vpop.eup %5620 }
 0x2e7   :  { %v4045_v19 = vmul.bf16 1056980736, %v5621_v57 }
 0x2e8   :  { %v5623_v63 = vpop.eup %5622 }
 0x2e9   :  { %v4046_v58 = vmul.bf16 1056980736, %v5623_v63  ;;  %v4049_v1 = vadd.bf16 1056980736, %v4045_v19  ;;  %v4397_v63 = vrot.slane %v4392_v55, %v5846_v45 }
 0x2eb   :  { %v4050_v59 = vadd.bf16 1056980736, %v4046_v58 }
 0x2ed   :  { %4341 = vmatprep.mubr.bf16.mxu0 %v4050_v59 }
 0x2ee   :  { %4342 = vmatmul.mubr.bf16.vlgmr.msra.gmra.mxu0 %v4049_v1 }
 0x2ef   :  { %5143 = vmatpush3.bf16.msra.mxu0 %v5596_v40  ;;  %5158 = vmatprep.mubr.msk.bf16.mxu0 %vm5727_vm0, %v5726_v41 }
 0x2f0   :  { %5144 = vmatprep.subr.bf16.mxu0 %v5726_v41 }
 0x2f3   :  { %5145 = vmatpush3.bf16.msra.mxu0 %v5597_v44 }
 0x2f4   :  { %5146 = vmatprep.subr.bf16.mxu0 %v5726_v41 }
 0x2f7   :  { %5147 = vmatpush3.bf16.msra.mxu0 %v5598_v53 }
 0x2f8   :  { %5148 = vmatprep.subr.bf16.mxu0 %v5726_v41 }
 0x2fb   :  { %5149 = vmatpush3.bf16.msra.mxu0 %v5599_v47 }
 0x2fc   :  { %5150 = vmatprep.subr.bf16.mxu0 %v5726_v41 }
 0x2ff   :  { %5151 = vmatpush3.bf16.msra.mxu0 %v5600_v48 }
 0x300   :  { %5152 = vmatprep.subr.bf16.mxu0 %v5726_v41 }
 0x303   :  { %5153 = vmatpush3.bf16.msra.mxu0 %v5601_v29 }
 0x304   :  { %5154 = vmatprep.subr.bf16.mxu0 %v5726_v41 }
 0x307   :  { %5155 = vmatpush3.bf16.msra.mxu0 %v5602_v49 }
 0x308   :  { %5156 = vmatprep.subr.bf16.mxu0 %v5726_v41 }
 0x30b   :  { %5157 = vmatpush3.bf16.msra.mxu0 %v5603_v50 }
 0x30f   :  { %v3886_v2 = vpop.f32.mrf.mxu1  ;;  %v3927_v3 = vpop.f32.mrf.mxu0 }
 0x310   :  { %v3887_v4 = vadd.f32 %v3886_v2, %v3845_v30  ;;  %v4032_v30 = vrot.slane %v4027_v24, %v5846_v45 }
 0x311   :  { %v3888_v5 = vpop.f32.mrf.mxu1  ;;  %v3929_v6 = vpop.f32.mrf.mxu0 }
 0x312   :  { %v3928_v7 = vadd.f32 %v3927_v3, %v3887_v4  ;;  %v3889_v39 = vadd.f32 %v3888_v5, %v5949_v60  ;;  %v5080_v4 = vld [vmem:[%s6001_s8] ss:$0 sm:$0xff] }
 0x313   :  { %v3890_v8 = vpop.f32.mrf.mxu1  ;;  %v3931_v9 = vpop.f32.mrf.mxu0 }
 0x314   :  { %v3930_v26 = vadd.f32 %v3929_v6, %v3889_v39 }
 0x315   :  { %v3891_v10 = vpop.f32.mrf.mxu1  ;;  %v3932_v13 = vpop.f32.mrf.mxu0 }
 0x34f   :  { %v3968_v25 = vpop.f32.mrf.mxu1 }
 0x350   :  { %v3969_v23 = vadd.f32 %v3968_v25, %v3928_v7 }
 0x351   :  { %v3970_v20 = vpop.f32.mrf.mxu1 }
 0x352   :  { %v3977_v54 = vpack.c.bf16 %v3969_v23, %v3969_v23  ;;  %v3971_v28 = vadd.f32 %v3970_v20, %v3930_v26 }
 0x353   :  { %v3972_v12 = vpop.f32.mrf.mxu1 }
 0x354   :  { %v4035_v56 = vadd.bf16 %v4025_v27, %v3977_v54  ;;  %v3978_v32 = vpack.c.bf16 %v3971_v28, %v3971_v28 }
 0x355   :  { %v3973_v31 = vpop.f32.mrf.mxu1 }
 0x356   :  { %v4039_v33 = vmul.bf16 1056980736, %v4035_v56  ;;  %v4036_v11 = vadd.bf16 %v4032_v30, %v3978_v32 }
 0x358   :  { %5624 = vtanh.bf16 %v4039_v33  ;;  %v4040_v60 = vmul.bf16 1056980736, %v4036_v11 }
 0x35a   :  { %5626 = vtanh.bf16 %v4040_v60 }
 0x366   :  { %v5625_v35 = vpop.eup %5624 }
 0x367   :  { %v4047_v14 = vmul.bf16 1056980736, %v5625_v35 }
 0x368   :  { %v5627_v21 = vpop.eup %5626 }
 0x369   :  { %v4048_v36 = vmul.bf16 1056980736, %v5627_v21  ;;  %v4051_v38 = vadd.bf16 1056980736, %v4047_v14 }
 0x36b   :  { %v4052_v37 = vadd.bf16 1056980736, %v4048_v36 }
 0x36d   :  { %4381 = vmatprep.mubr.bf16.mxu1 %v4052_v37 }
 0x36e   :  { %4382 = vmatmul.mubr.bf16.vlgmr.msra.gmra.mxu1 %v4051_v38 }
 0x3ae   :  { %v5105_v15 = vpop.f32.mrf.mxu0 }
 0x3b0   :  { %v5106_v42 = vpop.f32.mrf.mxu0 }
 0x3b1   :  { %v5107_v34 = vadd.f32 %v5106_v42, %v5105_v15 }
 0x3b2   :  { %v5108_v43 = vpop.f32.mrf.mxu0 }
 0x3b4   :  { %v5109_v46 = vpop.f32.mrf.mxu0 }
 0x42e   :  { %v5127_v52 = vpop.f32.mrf.mxu1 }
 0x430   :  { %v5128_v16 = vpop.f32.mrf.mxu1 }
 0x431   :  { %v5129_v57 = vadd.f32 %v5128_v16, %v5127_v52 }
 0x432   :  { %v5130_v61 = vpop.f32.mrf.mxu1 }
 0x433   :  { %v4384_v62 = vadd.f32 %v5129_v57, %v5107_v34 }
 0x434   :  { %v5131_v19 = vpop.f32.mrf.mxu1 }
 0x435   :  { %v4389_v0 = vpack.c.bf16 %v4384_v62, %v4384_v62 }
 0x437   :  { %v4398_v58 = vadd.bf16 %v4397_v63, %v4389_v0 }
 0x439   :  { %v4399_v59 = vmul.bf16 1056980736, %v4398_v58 }
 0x43b   :  { %5628 = vtanh.bf16 %v4399_v59 }
 0x449   :  { %v5629_v1 = vpop.eup %5628 }
 0x44a   :  { %v4401_v2 = vmul.bf16 1056980736, %v5629_v1 }
 0x44c   :  { %v4402_v3 = vadd.bf16 1056980736, %v4401_v2 }
 0x44e   :  { %5159 = vmatmul.mubr.bf16.vlgmr.msra.gmra.mxu0 %v4402_v3 }
 0x50e   :  { %v4508_v5 = vpop.f32.mrf.mxu0 }
 0x50f   :  { %v4509_v6 = vadd.f32 %v5080_v4, %v4508_v5 }
 0x510   :  { %v5160_v7 = vpop.f32.mrf.mxu0 }
 0x511   :  { %4514 = vst [vmem:[#allocation8] sm:$0xff] %v4509_v6 }
 0x512   :  { %v4511_v45 = vpop.f32.mrf.mxu0 }
 0x513   :  { %5701 = shalt.err (!%p5698_p5)
}
 0x514   :  { %4524 = dma.vmem_to_hbm [thread:$0]  %s4522_s1, 128, %s6002_s9, [#allocation4]   ;;  %v5161_v8 = vpop.f32.mrf.mxu0 }
 0x515   :  { %5714 = dma.done.wait [#allocation4], 128  }
 0x516   :  { %5715 = vsyncadd [#allocation4], 4294967168 }
 0x517   :  { %4528 = vsyncpa [#allocation3], 1 }
 0x518   :  { %4529 = vsyncpa [#allocation6], 1 }
 0x519   :  { %4530 = vsyncpa [#allocation4], 1 }

</bundles_post_ra>
